<compile_context>
chip_gen: v7x
topology: tpu7x:2x2x1
jax: 0.10.0
libtpu: 0.0.40
codegen_flags: <defaults>
</compile_context>

<pallas_src>
import math
import functools

import jax
import jax.numpy as jnp
from jax.experimental import pallas as pl
from jax.experimental.pallas import tpu as pltpu

EPS = 1e-6
NEG_INF = -1e9
F32 = jnp.float32
BF16 = jnp.bfloat16


# ----------------------------- in-kernel helpers -----------------------------

def _layer_norm(x, alpha, bias, d):
    # matches: alpha * (x - mean) / (x.std(dim=-1, unbiased) + eps) + bias
    mean = jnp.mean(x, axis=-1, keepdims=True)
    var = jnp.sum((x - mean) ** 2, axis=-1, keepdims=True) * (1.0 / (d - 1))
    std = jnp.sqrt(var)
    return alpha * (x - mean) / (std + EPS) + bias


def _split_heads(x2d_bf16, heads, dk):
    # (S, D) -> (H, S, dk)
    s = x2d_bf16.shape[0]
    return jnp.transpose(x2d_bf16.reshape(s, heads, dk), (1, 0, 2))


def _attention(q, k, v, mask_bias, heads):
    """q:(Sq,D) k,v:(Sk,D) f32 projected inputs; mask_bias:(Sq,Sk) or (1,Sk) f32 additive."""
    sq, d = q.shape
    dk = d // heads
    scale = 1.0 / math.sqrt(dk)

    qh = _split_heads(q.astype(BF16), heads, dk)        # (H, Sq, dk) bf16
    kh = _split_heads(k.astype(BF16), heads, dk)        # (H, Sk, dk) bf16
    vh = _split_heads(v.astype(BF16), heads, dk)        # (H, Sk, dk) bf16

    # one batched MXU matmul over all heads (no K transpose; contract last dims)
    s = jnp.einsum("hqd,hkd->hqk", qh, kh, preferred_element_type=F32)
    s = s * scale + mask_bias[None]                     # single broadcast add

    m = jnp.max(s, axis=-1, keepdims=True)
    p = jnp.exp(s - m)
    p = p * pl.reciprocal(jnp.sum(p, axis=-1, keepdims=True), approx=True)

    o = jnp.einsum("hqk,hkd->hqd", p.astype(BF16), vh, preferred_element_type=F32)
    return jnp.transpose(o, (1, 0, 2)).reshape(sq, d)   # (Sq, D) f32


# --------------------------------- kernel ------------------------------------

def decoder_layer_kernel(
        x_ref, enc_ref, smask_ref, tmask_ref,
        norm_ref,                 # (6, D) f32: a1, b1, a2, b2, a3, b3
        dbias_ref,                # (4, D) f32: bo1, bq2, bo2, bff2
        wqkv1_ref, bqkv1_ref, wo1_ref,          # self-attn  (bf16 weights, f32 biases)
        wq2_ref, wkv2_ref, bkv2_ref, wo2_ref,   # cross-attn
        wf1_ref, bf1_ref, wf2_ref,              # feed-forward
        out_ref,
        *, heads):
    x = x_ref[0]            # (Sq, D) f32
    enc = enc_ref[0]        # (Sk, D) f32
    d = x.shape[-1]

    # additive mask biases, computed once per block from int8 masks (exact compare)
    t_bias = jnp.where(tmask_ref[0].astype(jnp.int32) == 0, NEG_INF, 0.0)   # (Sq, Sq)
    s_bias = jnp.where(smask_ref[0].astype(jnp.int32) == 0, NEG_INF, 0.0)   # (1, Sk)

    a1, nb1 = norm_ref[0:1, :], norm_ref[1:2, :]
    a2, nb2 = norm_ref[2:3, :], norm_ref[3:4, :]
    a3, nb3 = norm_ref[4:5, :], norm_ref[5:6, :]
    bo1, bq2 = dbias_ref[0:1, :], dbias_ref[1:2, :]
    bo2, bf2 = dbias_ref[2:3, :], dbias_ref[3:4, :]

    # --- block 1: masked self attention ---
    nx1 = _layer_norm(x, a1, nb1, d)
    qkv = jnp.dot(nx1.astype(BF16), wqkv1_ref[...],
                  preferred_element_type=F32) + bqkv1_ref[...]              # (Sq, 3D)
    att1 = _attention(qkv[:, :d], qkv[:, d:2 * d], qkv[:, 2 * d:], t_bias, heads)
    x = x + (jnp.dot(att1.astype(BF16), wo1_ref[...],
                     preferred_element_type=F32) + bo1)                     # dropout_1 == id

    # --- block 2: cross attention over encoder output ---
    nx2 = _layer_norm(x, a2, nb2, d)
    q2 = jnp.dot(nx2.astype(BF16), wq2_ref[...], preferred_element_type=F32) + bq2
    kv = jnp.dot(enc.astype(BF16), wkv2_ref[...],
                 preferred_element_type=F32) + bkv2_ref[...]                # (Sk, 2D)
    att2 = _attention(q2, kv[:, :d], kv[:, d:], s_bias, heads)
    x = x + (jnp.dot(att2.astype(BF16), wo2_ref[...],
                     preferred_element_type=F32) + bo2)                     # dropout_2 == id

    # --- block 3: feed forward ---
    nx3 = _layer_norm(x, a3, nb3, d)
    h = jnp.maximum(jnp.dot(nx3.astype(BF16), wf1_ref[...],
                            preferred_element_type=F32) + bf1_ref[...], 0.0)
    ff = jnp.dot(h.astype(BF16), wf2_ref[...], preferred_element_type=F32) + bf2
    x = x + ff                                                              # dropout_3 == id

    out_ref[0] = x.astype(out_ref.dtype)


# -------------------------------- wrapper ------------------------------------

def decoder_layer(x, enc, source_mask, target_mask, params, *, heads):
    B, Sq, D = x.shape
    _, Sk, _ = enc.shape
    assert D % heads == 0, "heads must divide dim_model"

    def w_t(*names):   # torch (out,in) weights -> fused (in, sum(out)) bf16 (so kernel does x @ w)
        return jnp.concatenate(
            [jnp.asarray(params[n], F32).T for n in names], axis=1).astype(BF16)

    def row(*names):   # 1-D biases -> fused (1, sum(n)) f32 row
        return jnp.concatenate(
            [jnp.asarray(params[n], F32) for n in names]).reshape(1, -1)

    def rows(*names):  # stack same-width 1-D params -> (k, D) f32
        return jnp.stack([jnp.asarray(params[n], F32) for n in names], axis=0)

    norm_pack = rows("norm1_alpha", "norm1_bias",
                     "norm2_alpha", "norm2_bias",
                     "norm3_alpha", "norm3_bias")                      # (6, D)
    dbias_pack = rows("attn1_bo", "attn2_bq", "attn2_bo", "ff_b2")     # (4, D)

    kernel_params = [
        norm_pack, dbias_pack,
        # self-attention: fused QKV
        w_t("attn1_wq", "attn1_wk", "attn1_wv"), row("attn1_bq", "attn1_bk", "attn1_bv"),
        w_t("attn1_wo"),
        # cross-attention: Q separate, fused KV
        w_t("attn2_wq"),
        w_t("attn2_wk", "attn2_wv"), row("attn2_bk", "attn2_bv"),
        w_t("attn2_wo"),
        # feed-forward
        w_t("ff_w1"), row("ff_b1"),
        w_t("ff_w2"),
    ]

    # int8 masks: exact ==0 compare in-kernel, 4x less HBM traffic than f32
    smask_i8 = (jnp.asarray(source_mask) != 0).astype(jnp.int8)
    tmask_i8 = (jnp.asarray(target_mask) != 0).astype(jnp.int8)

    data_specs = [
        pl.BlockSpec((1, Sq, D), lambda b: (b, 0, 0)),    # x
        pl.BlockSpec((1, Sk, D), lambda b: (b, 0, 0)),    # encoder output
        pl.BlockSpec((1, 1, Sk), lambda b: (b, 0, 0)),    # source mask (int8)
        pl.BlockSpec((1, Sq, Sq), lambda b: (b, 0, 0)),   # target mask (int8)
    ]
    # parameters: full 2-D arrays, grid-invariant
    param_specs = [pl.BlockSpec(kp.shape, lambda b: (0, 0)) for kp in kernel_params]

    # VMEM limit from actual footprint (double-buffered) + headroom, clamped to the
    # v7x-safe 64 MiB ceiling.
    param_bytes = sum(int(kp.size) * kp.dtype.itemsize for kp in kernel_params)
    tile_bytes = 4 * (Sq * D + Sk * D + Sq * D) + Sq * Sq + Sk
    vmem_limit = int(min(64 << 20, max(16 << 20, 2 * (param_bytes + tile_bytes) + (4 << 20))))

    out = pl.pallas_call(
        functools.partial(decoder_layer_kernel, heads=heads),
        out_shape=jax.ShapeDtypeStruct((B, Sq, D), jnp.float32),
        grid_spec=pltpu.PrefetchScalarGridSpec(
            num_scalar_prefetch=0,
            grid=(B,),
            in_specs=data_specs + param_specs,
            out_specs=pl.BlockSpec((1, Sq, D), lambda b: (b, 0, 0)),
        ),
        compiler_params=pltpu.CompilerParams(
            dimension_semantics=("parallel",),     # batch rows independent -> megacore
            vmem_limit_bytes=vmem_limit,
        ),
    )(x, enc, smask_i8, tmask_i8, *kernel_params)
    return out


# -------------------------- deterministic param init -------------------------

def init_params(key, d_model, d_ff):
    keys = iter(jax.random.split(key, 64))

    def lin(out_d, in_d):
        w = jax.random.normal(next(keys), (out_d, in_d), jnp.float32) * 0.05
        b = jax.random.normal(next(keys), (out_d,), jnp.float32) * 0.05
        return w, b

    p = {}
    for i in (1, 2, 3):
        p[f"norm{i}_alpha"] = jnp.ones((d_model,), jnp.float32)
        p[f"norm{i}_bias"] = jnp.zeros((d_model,), jnp.float32)
    for i in (1, 2):
        for name in ("q", "k", "v", "o"):
            w, b = lin(d_model, d_model)
            p[f"attn{i}_w{name}"] = w
            p[f"attn{i}_b{name}"] = b
    p["ff_w1"], p["ff_b1"] = lin(d_ff, d_model)
    p["ff_w2"], p["ff_b2"] = lin(d_model, d_ff)
    return p


# ---------------------------------- main -------------------------------------

if __name__ == "__main__":
    B, Sq, Sk, D, H = 2, 8, 12, 32, 4
    D_FF = 64   # small stand-in for FeedForward's hidden width

    key = jax.random.PRNGKey(0)
    kx, ke, kp = jax.random.split(key, 3)

    x = jax.random.normal(kx, (B, Sq, D), jnp.float32)
    enc = jax.random.normal(ke, (B, Sk, D), jnp.float32)

    # causal target mask (B, Sq, Sq); source mask blanks the last 2 encoder positions (B, 1, Sk)
    target_mask = jnp.broadcast_to(
        jnp.tril(jnp.ones((Sq, Sq), jnp.float32))[None], (B, Sq, Sq))
    source_mask = jnp.concatenate(
        [jnp.ones((B, 1, Sk - 2), jnp.float32), jnp.zeros((B, 1, 2), jnp.float32)], axis=-1)

    params = init_params(kp, D, D_FF)

    out = decoder_layer(x, enc, source_mask, target_mask, params, heads=H)
    jax.block_until_ready(out)
    assert out.shape == (B, Sq, D) and out.dtype == jnp.float32
    print("KERNEL_OK")
</pallas_src>

<mosaic_0001>
module attributes {stable_mosaic.version = 11 : i64} {
  func.func @decoder_layer_kernel(%arg0: i32, %arg1: memref<1x8x32xf32, #tpu.memory_space<vmem>>, %arg2: memref<1x12x32xf32, #tpu.memory_space<vmem>>, %arg3: memref<1x1x12xi8, #tpu.memory_space<vmem>>, %arg4: memref<1x8x8xi8, #tpu.memory_space<vmem>>, %arg5: memref<6x32xf32, #tpu.memory_space<vmem>>, %arg6: memref<4x32xf32, #tpu.memory_space<vmem>>, %arg7: memref<32x96xbf16, #tpu.memory_space<vmem>>, %arg8: memref<1x96xf32, #tpu.memory_space<vmem>>, %arg9: memref<32x32xbf16, #tpu.memory_space<vmem>>, %arg10: memref<32x32xbf16, #tpu.memory_space<vmem>>, %arg11: memref<32x64xbf16, #tpu.memory_space<vmem>>, %arg12: memref<1x64xf32, #tpu.memory_space<vmem>>, %arg13: memref<32x32xbf16, #tpu.memory_space<vmem>>, %arg14: memref<32x64xbf16, #tpu.memory_space<vmem>>, %arg15: memref<1x64xf32, #tpu.memory_space<vmem>>, %arg16: memref<64x32xbf16, #tpu.memory_space<vmem>>, %arg17: memref<1x8x32xf32, #tpu.memory_space<vmem>>) attributes {dimension_semantics = [#tpu.dimension_semantics<parallel>], iteration_bounds = array<i64: 2>, scalar_prefetch = 0 : i64, scratch_operands = 0 : i64, tpu.core_type = #tpu.core_type<tc>, window_params = [{transform_indices = @transform_0, window_bounds = array<i64: 1, 8, 32>}, {transform_indices = @transform_1, window_bounds = array<i64: 1, 12, 32>}, {transform_indices = @transform_2, window_bounds = array<i64: 1, 1, 12>}, {transform_indices = @transform_3, window_bounds = array<i64: 1, 8, 8>}, {pipeline_mode = #tpu.pipeline_mode<synchronous>, transform_indices = @transform_4, window_bounds = array<i64: 6, 32>}, {pipeline_mode = #tpu.pipeline_mode<synchronous>, transform_indices = @transform_5, window_bounds = array<i64: 4, 32>}, {pipeline_mode = #tpu.pipeline_mode<synchronous>, transform_indices = @transform_6, window_bounds = array<i64: 32, 96>}, {pipeline_mode = #tpu.pipeline_mode<synchronous>, transform_indices = @transform_7, window_bounds = array<i64: 1, 96>}, {pipeline_mode = #tpu.pipeline_mode<synchronous>, transform_indices = @transform_8, window_bounds = array<i64: 32, 32>}, {pipeline_mode = #tpu.pipeline_mode<synchronous>, transform_indices = @transform_9, window_bounds = array<i64: 32, 32>}, {pipeline_mode = #tpu.pipeline_mode<synchronous>, transform_indices = @transform_10, window_bounds = array<i64: 32, 64>}, {pipeline_mode = #tpu.pipeline_mode<synchronous>, transform_indices = @transform_11, window_bounds = array<i64: 1, 64>}, {pipeline_mode = #tpu.pipeline_mode<synchronous>, transform_indices = @transform_12, window_bounds = array<i64: 32, 32>}, {pipeline_mode = #tpu.pipeline_mode<synchronous>, transform_indices = @transform_13, window_bounds = array<i64: 32, 64>}, {pipeline_mode = #tpu.pipeline_mode<synchronous>, transform_indices = @transform_14, window_bounds = array<i64: 1, 64>}, {pipeline_mode = #tpu.pipeline_mode<synchronous>, transform_indices = @transform_15, window_bounds = array<i64: 64, 32>}, {transform_indices = @transform_16, window_bounds = array<i64: 1, 8, 32>}]} {
    %c0 = arith.constant 0 : index
    %c0_0 = arith.constant 0 : index
    %c0_1 = arith.constant 0 : index
    %0 = vector.load %arg1[%c0, %c0_0, %c0_1] : memref<1x8x32xf32, #tpu.memory_space<vmem>>, vector<1x8x32xf32>
    %1 = vector.shape_cast %0 : vector<1x8x32xf32> to vector<8x32xf32>
    %c0_2 = arith.constant 0 : index
    %c0_3 = arith.constant 0 : index
    %c0_4 = arith.constant 0 : index
    %2 = vector.load %arg2[%c0_2, %c0_3, %c0_4] : memref<1x12x32xf32, #tpu.memory_space<vmem>>, vector<1x12x32xf32>
    %3 = vector.shape_cast %2 : vector<1x12x32xf32> to vector<12x32xf32>
    %c0_5 = arith.constant 0 : index
    %c0_6 = arith.constant 0 : index
    %c0_7 = arith.constant 0 : index
    %4 = vector.load %arg4[%c0_5, %c0_6, %c0_7] : memref<1x8x8xi8, #tpu.memory_space<vmem>>, vector<1x8x8xi8>
    %5 = vector.shape_cast %4 : vector<1x8x8xi8> to vector<8x8xi8>
    %6 = arith.extsi %5 : vector<8x8xi8> to vector<8x8xi32>
    %c0_i32 = arith.constant 0 : i32
    %7 = vector.broadcast %c0_i32 : i32 to vector<8x8xi32>
    %8 = arith.cmpi eq, %6, %7 : vector<8x8xi32>
    %cst = arith.constant -1.000000e+09 : f32
    %cst_8 = arith.constant 0.000000e+00 : f32
    %9 = vector.broadcast %cst : f32 to vector<8x8xf32>
    %10 = vector.broadcast %cst_8 : f32 to vector<8x8xf32>
    %11 = arith.select %8, %9, %10 : vector<8x8xi1>, vector<8x8xf32>
    %c0_9 = arith.constant 0 : index
    %c0_10 = arith.constant 0 : index
    %c0_11 = arith.constant 0 : index
    %12 = vector.load %arg3[%c0_9, %c0_10, %c0_11] : memref<1x1x12xi8, #tpu.memory_space<vmem>>, vector<1x1x12xi8>
    %13 = vector.shape_cast %12 : vector<1x1x12xi8> to vector<1x12xi8>
    %14 = arith.extsi %13 : vector<1x12xi8> to vector<1x12xi32>
    %c0_i32_12 = arith.constant 0 : i32
    %15 = vector.broadcast %c0_i32_12 : i32 to vector<1x12xi32>
    %16 = arith.cmpi eq, %14, %15 : vector<1x12xi32>
    %cst_13 = arith.constant -1.000000e+09 : f32
    %cst_14 = arith.constant 0.000000e+00 : f32
    %17 = vector.broadcast %cst_13 : f32 to vector<1x12xf32>
    %18 = vector.broadcast %cst_14 : f32 to vector<1x12xf32>
    %19 = arith.select %16, %17, %18 : vector<1x12xi1>, vector<1x12xf32>
    %c0_15 = arith.constant 0 : index
    %c0_16 = arith.constant 0 : index
    %20 = vector.load %arg5[%c0_15, %c0_16] : memref<6x32xf32, #tpu.memory_space<vmem>>, vector<1x32xf32>
    %c1 = arith.constant 1 : index
    %c0_17 = arith.constant 0 : index
    %21 = vector.load %arg5[%c1, %c0_17] : memref<6x32xf32, #tpu.memory_space<vmem>>, vector<1x32xf32>
    %c2 = arith.constant 2 : index
    %c0_18 = arith.constant 0 : index
    %22 = vector.load %arg5[%c2, %c0_18] : memref<6x32xf32, #tpu.memory_space<vmem>>, vector<1x32xf32>
    %c3 = arith.constant 3 : index
    %c0_19 = arith.constant 0 : index
    %23 = vector.load %arg5[%c3, %c0_19] : memref<6x32xf32, #tpu.memory_space<vmem>>, vector<1x32xf32>
    %c4 = arith.constant 4 : index
    %c0_20 = arith.constant 0 : index
    %24 = vector.load %arg5[%c4, %c0_20] : memref<6x32xf32, #tpu.memory_space<vmem>>, vector<1x32xf32>
    %c5 = arith.constant 5 : index
    %c0_21 = arith.constant 0 : index
    %25 = vector.load %arg5[%c5, %c0_21] : memref<6x32xf32, #tpu.memory_space<vmem>>, vector<1x32xf32>
    %c0_22 = arith.constant 0 : index
    %c0_23 = arith.constant 0 : index
    %26 = vector.load %arg6[%c0_22, %c0_23] : memref<4x32xf32, #tpu.memory_space<vmem>>, vector<1x32xf32>
    %c1_24 = arith.constant 1 : index
    %c0_25 = arith.constant 0 : index
    %27 = vector.load %arg6[%c1_24, %c0_25] : memref<4x32xf32, #tpu.memory_space<vmem>>, vector<1x32xf32>
    %c2_26 = arith.constant 2 : index
    %c0_27 = arith.constant 0 : index
    %28 = vector.load %arg6[%c2_26, %c0_27] : memref<4x32xf32, #tpu.memory_space<vmem>>, vector<1x32xf32>
    %c3_28 = arith.constant 3 : index
    %c0_29 = arith.constant 0 : index
    %29 = vector.load %arg6[%c3_28, %c0_29] : memref<4x32xf32, #tpu.memory_space<vmem>>, vector<1x32xf32>
    %cst_30 = arith.constant dense<0.000000e+00> : vector<8xf32>
    %30 = vector.multi_reduction <add>, %1, %cst_30 [1] : vector<8x32xf32> to vector<8xf32>
    %31 = vector.shape_cast %30 : vector<8xf32> to vector<8x1xf32>
    %cst_31 = arith.constant 3.200000e+01 : f32
    %32 = vector.broadcast %cst_31 : f32 to vector<8x1xf32>
    %33 = arith.divf %31, %32 : vector<8x1xf32>
    %34 = vector.broadcast %33 : vector<8x1xf32> to vector<8x32xf32>
    %35 = arith.subf %1, %34 : vector<8x32xf32>
    %36 = arith.mulf %35, %35 : vector<8x32xf32>
    %cst_32 = arith.constant dense<0.000000e+00> : vector<8xf32>
    %37 = vector.multi_reduction <add>, %36, %cst_32 [1] : vector<8x32xf32> to vector<8xf32>
    %38 = vector.shape_cast %37 : vector<8xf32> to vector<8x1xf32>
    %cst_33 = arith.constant 0.0322580636 : f32
    %39 = vector.broadcast %cst_33 : f32 to vector<8x1xf32>
    %40 = arith.mulf %38, %39 : vector<8x1xf32>
    %41 = math.sqrt %40 : vector<8x1xf32>
    %42 = vector.broadcast %33 : vector<8x1xf32> to vector<8x32xf32>
    %43 = arith.subf %1, %42 : vector<8x32xf32>
    %44 = vector.broadcast %20 : vector<1x32xf32> to vector<8x32xf32>
    %45 = arith.mulf %44, %43 : vector<8x32xf32>
    %cst_34 = arith.constant 9.99999997E-7 : f32
    %46 = vector.broadcast %cst_34 : f32 to vector<8x1xf32>
    %47 = arith.addf %41, %46 : vector<8x1xf32>
    %48 = vector.broadcast %47 : vector<8x1xf32> to vector<8x32xf32>
    %49 = arith.divf %45, %48 : vector<8x32xf32>
    %50 = vector.broadcast %21 : vector<1x32xf32> to vector<8x32xf32>
    %51 = arith.addf %49, %50 : vector<8x32xf32>
    %52 = arith.truncf %51 : vector<8x32xf32> to vector<8x32xbf16>
    %c0_35 = arith.constant 0 : index
    %c0_36 = arith.constant 0 : index
    %53 = vector.load %arg7[%c0_35, %c0_36] : memref<32x96xbf16, #tpu.memory_space<vmem>>, vector<32x96xbf16>
    %cst_37 = arith.constant dense<0.000000e+00> : vector<8x96xf32>
    %54 = tpu.matmul %52, %53, %cst_37 {dimension_numbers = #tpu.dot_dimension_numbers<[1], [0], [0], [1], [0, 0, 1, 1], [], []>} : vector<8x32xbf16>, vector<32x96xbf16>, vector<8x96xf32> -> vector<8x96xf32>
    %c0_38 = arith.constant 0 : index
    %c0_39 = arith.constant 0 : index
    %55 = vector.load %arg8[%c0_38, %c0_39] : memref<1x96xf32, #tpu.memory_space<vmem>>, vector<1x96xf32>
    %56 = vector.broadcast %55 : vector<1x96xf32> to vector<8x96xf32>
    %57 = arith.addf %54, %56 : vector<8x96xf32>
    %58 = vector.extract_strided_slice %57 {offsets = [0, 0], sizes = [8, 32], strides = [1, 1]} : vector<8x96xf32> to vector<8x32xf32>
    %59 = vector.extract_strided_slice %57 {offsets = [0, 32], sizes = [8, 32], strides = [1, 1]} : vector<8x96xf32> to vector<8x32xf32>
    %60 = vector.extract_strided_slice %57 {offsets = [0, 64], sizes = [8, 32], strides = [1, 1]} : vector<8x96xf32> to vector<8x32xf32>
    %61 = arith.truncf %58 : vector<8x32xf32> to vector<8x32xbf16>
    %62 = vector.shape_cast %61 : vector<8x32xbf16> to vector<8x4x8xbf16>
    %63 = tpu.transpose %62, [1, 0, 2] : vector<8x4x8xbf16> -> vector<4x8x8xbf16>
    %64 = arith.truncf %59 : vector<8x32xf32> to vector<8x32xbf16>
    %65 = vector.shape_cast %64 : vector<8x32xbf16> to vector<8x4x8xbf16>
    %66 = tpu.transpose %65, [1, 0, 2] : vector<8x4x8xbf16> -> vector<4x8x8xbf16>
    %67 = arith.truncf %60 : vector<8x32xf32> to vector<8x32xbf16>
    %68 = vector.shape_cast %67 : vector<8x32xbf16> to vector<8x4x8xbf16>
    %69 = tpu.transpose %68, [1, 0, 2] : vector<8x4x8xbf16> -> vector<4x8x8xbf16>
    "tpu.trace_start"() <{level = 10 : i32, message = "hqd,hkd->hqk"}> : () -> ()
    %cst_40 = arith.constant dense<0.000000e+00> : vector<4x8x8xf32>
    %70 = tpu.matmul %63, %66, %cst_40 {dimension_numbers = #tpu.dot_dimension_numbers<[2], [2], [1], [1], [0, 0, 0, 1, 1, 1], [0], [0]>} : vector<4x8x8xbf16>, vector<4x8x8xbf16>, vector<4x8x8xf32> -> vector<4x8x8xf32>
    "tpu.trace_stop"() : () -> ()
    %cst_41 = arith.constant 0.353553385 : f32
    %71 = vector.broadcast %cst_41 : f32 to vector<4x8x8xf32>
    %72 = arith.mulf %70, %71 : vector<4x8x8xf32>
    %73 = vector.shape_cast %11 : vector<8x8xf32> to vector<1x8x8xf32>
    %74 = vector.broadcast %73 : vector<1x8x8xf32> to vector<4x8x8xf32>
    %75 = arith.addf %72, %74 : vector<4x8x8xf32>
    %cst_42 = arith.constant dense<0xFF800000> : vector<4x8xf32>
    %76 = vector.multi_reduction <maximumf>, %75, %cst_42 [2] : vector<4x8x8xf32> to vector<4x8xf32>
    %77 = vector.shape_cast %76 : vector<4x8xf32> to vector<4x8x1xf32>
    %78 = vector.broadcast %77 : vector<4x8x1xf32> to vector<4x8x8xf32>
    %79 = arith.subf %75, %78 : vector<4x8x8xf32>
    %80 = math.exp %79 : vector<4x8x8xf32>
    %cst_43 = arith.constant dense<0.000000e+00> : vector<4x8xf32>
    %81 = vector.multi_reduction <add>, %80, %cst_43 [2] : vector<4x8x8xf32> to vector<4x8xf32>
    %82 = vector.shape_cast %81 : vector<4x8xf32> to vector<4x8x1xf32>
    %83 = tpu.reciprocal %82 {approx = true} : vector<4x8x1xf32> -> vector<4x8x1xf32>
    %84 = vector.broadcast %83 : vector<4x8x1xf32> to vector<4x8x8xf32>
    %85 = arith.mulf %80, %84 : vector<4x8x8xf32>
    %86 = arith.truncf %85 : vector<4x8x8xf32> to vector<4x8x8xbf16>
    "tpu.trace_start"() <{level = 10 : i32, message = "hqk,hkd->hqd"}> : () -> ()
    %cst_44 = arith.constant dense<0.000000e+00> : vector<4x8x8xf32>
    %87 = tpu.matmul %86, %69, %cst_44 {dimension_numbers = #tpu.dot_dimension_numbers<[2], [1], [1], [2], [0, 0, 0, 1, 1, 2], [0], [0]>} : vector<4x8x8xbf16>, vector<4x8x8xbf16>, vector<4x8x8xf32> -> vector<4x8x8xf32>
    "tpu.trace_stop"() : () -> ()
    %88 = tpu.transpose %87, [1, 0, 2] : vector<4x8x8xf32> -> vector<8x4x8xf32>
    %89 = vector.shape_cast %88 : vector<8x4x8xf32> to vector<8x32xf32>
    %90 = arith.truncf %89 : vector<8x32xf32> to vector<8x32xbf16>
    %c0_45 = arith.constant 0 : index
    %c0_46 = arith.constant 0 : index
    %91 = vector.load %arg9[%c0_45, %c0_46] : memref<32x32xbf16, #tpu.memory_space<vmem>>, vector<32x32xbf16>
    %cst_47 = arith.constant dense<0.000000e+00> : vector<8x32xf32>
    %92 = tpu.matmul %90, %91, %cst_47 {dimension_numbers = #tpu.dot_dimension_numbers<[1], [0], [0], [1], [0, 0, 1, 1], [], []>} : vector<8x32xbf16>, vector<32x32xbf16>, vector<8x32xf32> -> vector<8x32xf32>
    %93 = vector.broadcast %26 : vector<1x32xf32> to vector<8x32xf32>
    %94 = arith.addf %92, %93 : vector<8x32xf32>
    %95 = arith.addf %1, %94 : vector<8x32xf32>
    %cst_48 = arith.constant dense<0.000000e+00> : vector<8xf32>
    %96 = vector.multi_reduction <add>, %95, %cst_48 [1] : vector<8x32xf32> to vector<8xf32>
    %97 = vector.shape_cast %96 : vector<8xf32> to vector<8x1xf32>
    %cst_49 = arith.constant 3.200000e+01 : f32
    %98 = vector.broadcast %cst_49 : f32 to vector<8x1xf32>
    %99 = arith.divf %97, %98 : vector<8x1xf32>
    %100 = vector.broadcast %99 : vector<8x1xf32> to vector<8x32xf32>
    %101 = arith.subf %95, %100 : vector<8x32xf32>
    %102 = arith.mulf %101, %101 : vector<8x32xf32>
    %cst_50 = arith.constant dense<0.000000e+00> : vector<8xf32>
    %103 = vector.multi_reduction <add>, %102, %cst_50 [1] : vector<8x32xf32> to vector<8xf32>
    %104 = vector.shape_cast %103 : vector<8xf32> to vector<8x1xf32>
    %cst_51 = arith.constant 0.0322580636 : f32
    %105 = vector.broadcast %cst_51 : f32 to vector<8x1xf32>
    %106 = arith.mulf %104, %105 : vector<8x1xf32>
    %107 = math.sqrt %106 : vector<8x1xf32>
    %108 = vector.broadcast %99 : vector<8x1xf32> to vector<8x32xf32>
    %109 = arith.subf %95, %108 : vector<8x32xf32>
    %110 = vector.broadcast %22 : vector<1x32xf32> to vector<8x32xf32>
    %111 = arith.mulf %110, %109 : vector<8x32xf32>
    %cst_52 = arith.constant 9.99999997E-7 : f32
    %112 = vector.broadcast %cst_52 : f32 to vector<8x1xf32>
    %113 = arith.addf %107, %112 : vector<8x1xf32>
    %114 = vector.broadcast %113 : vector<8x1xf32> to vector<8x32xf32>
    %115 = arith.divf %111, %114 : vector<8x32xf32>
    %116 = vector.broadcast %23 : vector<1x32xf32> to vector<8x32xf32>
    %117 = arith.addf %115, %116 : vector<8x32xf32>
    %118 = arith.truncf %117 : vector<8x32xf32> to vector<8x32xbf16>
    %c0_53 = arith.constant 0 : index
    %c0_54 = arith.constant 0 : index
    %119 = vector.load %arg10[%c0_53, %c0_54] : memref<32x32xbf16, #tpu.memory_space<vmem>>, vector<32x32xbf16>
    %cst_55 = arith.constant dense<0.000000e+00> : vector<8x32xf32>
    %120 = tpu.matmul %118, %119, %cst_55 {dimension_numbers = #tpu.dot_dimension_numbers<[1], [0], [0], [1], [0, 0, 1, 1], [], []>} : vector<8x32xbf16>, vector<32x32xbf16>, vector<8x32xf32> -> vector<8x32xf32>
    %121 = vector.broadcast %27 : vector<1x32xf32> to vector<8x32xf32>
    %122 = arith.addf %120, %121 : vector<8x32xf32>
    %123 = arith.truncf %3 : vector<12x32xf32> to vector<12x32xbf16>
    %c0_56 = arith.constant 0 : index
    %c0_57 = arith.constant 0 : index
    %124 = vector.load %arg11[%c0_56, %c0_57] : memref<32x64xbf16, #tpu.memory_space<vmem>>, vector<32x64xbf16>
    %cst_58 = arith.constant dense<0.000000e+00> : vector<12x64xf32>
    %125 = tpu.matmul %123, %124, %cst_58 {dimension_numbers = #tpu.dot_dimension_numbers<[1], [0], [0], [1], [0, 0, 1, 1], [], []>} : vector<12x32xbf16>, vector<32x64xbf16>, vector<12x64xf32> -> vector<12x64xf32>
    %c0_59 = arith.constant 0 : index
    %c0_60 = arith.constant 0 : index
    %126 = vector.load %arg12[%c0_59, %c0_60] : memref<1x64xf32, #tpu.memory_space<vmem>>, vector<1x64xf32>
    %127 = vector.broadcast %126 : vector<1x64xf32> to vector<12x64xf32>
    %128 = arith.addf %125, %127 : vector<12x64xf32>
    %129 = vector.extract_strided_slice %128 {offsets = [0, 0], sizes = [12, 32], strides = [1, 1]} : vector<12x64xf32> to vector<12x32xf32>
    %130 = vector.extract_strided_slice %128 {offsets = [0, 32], sizes = [12, 32], strides = [1, 1]} : vector<12x64xf32> to vector<12x32xf32>
    %131 = arith.truncf %122 : vector<8x32xf32> to vector<8x32xbf16>
    %132 = vector.shape_cast %131 : vector<8x32xbf16> to vector<8x4x8xbf16>
    %133 = tpu.transpose %132, [1, 0, 2] : vector<8x4x8xbf16> -> vector<4x8x8xbf16>
    %134 = arith.truncf %129 : vector<12x32xf32> to vector<12x32xbf16>
    %135 = vector.shape_cast %134 : vector<12x32xbf16> to vector<12x4x8xbf16>
    %136 = tpu.transpose %135, [1, 0, 2] : vector<12x4x8xbf16> -> vector<4x12x8xbf16>
    %137 = arith.truncf %130 : vector<12x32xf32> to vector<12x32xbf16>
    %138 = vector.shape_cast %137 : vector<12x32xbf16> to vector<12x4x8xbf16>
    %139 = tpu.transpose %138, [1, 0, 2] : vector<12x4x8xbf16> -> vector<4x12x8xbf16>
    "tpu.trace_start"() <{level = 10 : i32, message = "hqd,hkd->hqk"}> : () -> ()
    %cst_61 = arith.constant dense<0.000000e+00> : vector<4x8x12xf32>
    %140 = tpu.matmul %133, %136, %cst_61 {dimension_numbers = #tpu.dot_dimension_numbers<[2], [2], [1], [1], [0, 0, 0, 1, 1, 1], [0], [0]>} : vector<4x8x8xbf16>, vector<4x12x8xbf16>, vector<4x8x12xf32> -> vector<4x8x12xf32>
    "tpu.trace_stop"() : () -> ()
    %cst_62 = arith.constant 0.353553385 : f32
    %141 = vector.broadcast %cst_62 : f32 to vector<4x8x12xf32>
    %142 = arith.mulf %140, %141 : vector<4x8x12xf32>
    %143 = vector.shape_cast %19 : vector<1x12xf32> to vector<1x1x12xf32>
    %144 = vector.broadcast %143 : vector<1x1x12xf32> to vector<4x8x12xf32>
    %145 = arith.addf %142, %144 : vector<4x8x12xf32>
    %cst_63 = arith.constant dense<0xFF800000> : vector<4x8xf32>
    %146 = vector.multi_reduction <maximumf>, %145, %cst_63 [2] : vector<4x8x12xf32> to vector<4x8xf32>
    %147 = vector.shape_cast %146 : vector<4x8xf32> to vector<4x8x1xf32>
    %148 = vector.broadcast %147 : vector<4x8x1xf32> to vector<4x8x12xf32>
    %149 = arith.subf %145, %148 : vector<4x8x12xf32>
    %150 = math.exp %149 : vector<4x8x12xf32>
    %cst_64 = arith.constant dense<0.000000e+00> : vector<4x8xf32>
    %151 = vector.multi_reduction <add>, %150, %cst_64 [2] : vector<4x8x12xf32> to vector<4x8xf32>
    %152 = vector.shape_cast %151 : vector<4x8xf32> to vector<4x8x1xf32>
    %153 = tpu.reciprocal %152 {approx = true} : vector<4x8x1xf32> -> vector<4x8x1xf32>
    %154 = vector.broadcast %153 : vector<4x8x1xf32> to vector<4x8x12xf32>
    %155 = arith.mulf %150, %154 : vector<4x8x12xf32>
    %156 = arith.truncf %155 : vector<4x8x12xf32> to vector<4x8x12xbf16>
    "tpu.trace_start"() <{level = 10 : i32, message = "hqk,hkd->hqd"}> : () -> ()
    %cst_65 = arith.constant dense<0.000000e+00> : vector<4x8x8xf32>
    %157 = tpu.matmul %156, %139, %cst_65 {dimension_numbers = #tpu.dot_dimension_numbers<[2], [1], [1], [2], [0, 0, 0, 1, 1, 2], [0], [0]>} : vector<4x8x12xbf16>, vector<4x12x8xbf16>, vector<4x8x8xf32> -> vector<4x8x8xf32>
    "tpu.trace_stop"() : () -> ()
    %158 = tpu.transpose %157, [1, 0, 2] : vector<4x8x8xf32> -> vector<8x4x8xf32>
    %159 = vector.shape_cast %158 : vector<8x4x8xf32> to vector<8x32xf32>
    %160 = arith.truncf %159 : vector<8x32xf32> to vector<8x32xbf16>
    %c0_66 = arith.constant 0 : index
    %c0_67 = arith.constant 0 : index
    %161 = vector.load %arg13[%c0_66, %c0_67] : memref<32x32xbf16, #tpu.memory_space<vmem>>, vector<32x32xbf16>
    %cst_68 = arith.constant dense<0.000000e+00> : vector<8x32xf32>
    %162 = tpu.matmul %160, %161, %cst_68 {dimension_numbers = #tpu.dot_dimension_numbers<[1], [0], [0], [1], [0, 0, 1, 1], [], []>} : vector<8x32xbf16>, vector<32x32xbf16>, vector<8x32xf32> -> vector<8x32xf32>
    %163 = vector.broadcast %28 : vector<1x32xf32> to vector<8x32xf32>
    %164 = arith.addf %162, %163 : vector<8x32xf32>
    %165 = arith.addf %95, %164 : vector<8x32xf32>
    %cst_69 = arith.constant dense<0.000000e+00> : vector<8xf32>
    %166 = vector.multi_reduction <add>, %165, %cst_69 [1] : vector<8x32xf32> to vector<8xf32>
    %167 = vector.shape_cast %166 : vector<8xf32> to vector<8x1xf32>
    %cst_70 = arith.constant 3.200000e+01 : f32
    %168 = vector.broadcast %cst_70 : f32 to vector<8x1xf32>
    %169 = arith.divf %167, %168 : vector<8x1xf32>
    %170 = vector.broadcast %169 : vector<8x1xf32> to vector<8x32xf32>
    %171 = arith.subf %165, %170 : vector<8x32xf32>
    %172 = arith.mulf %171, %171 : vector<8x32xf32>
    %cst_71 = arith.constant dense<0.000000e+00> : vector<8xf32>
    %173 = vector.multi_reduction <add>, %172, %cst_71 [1] : vector<8x32xf32> to vector<8xf32>
    %174 = vector.shape_cast %173 : vector<8xf32> to vector<8x1xf32>
    %cst_72 = arith.constant 0.0322580636 : f32
    %175 = vector.broadcast %cst_72 : f32 to vector<8x1xf32>
    %176 = arith.mulf %174, %175 : vector<8x1xf32>
    %177 = math.sqrt %176 : vector<8x1xf32>
    %178 = vector.broadcast %169 : vector<8x1xf32> to vector<8x32xf32>
    %179 = arith.subf %165, %178 : vector<8x32xf32>
    %180 = vector.broadcast %24 : vector<1x32xf32> to vector<8x32xf32>
    %181 = arith.mulf %180, %179 : vector<8x32xf32>
    %cst_73 = arith.constant 9.99999997E-7 : f32
    %182 = vector.broadcast %cst_73 : f32 to vector<8x1xf32>
    %183 = arith.addf %177, %182 : vector<8x1xf32>
    %184 = vector.broadcast %183 : vector<8x1xf32> to vector<8x32xf32>
    %185 = arith.divf %181, %184 : vector<8x32xf32>
    %186 = vector.broadcast %25 : vector<1x32xf32> to vector<8x32xf32>
    %187 = arith.addf %185, %186 : vector<8x32xf32>
    %188 = arith.truncf %187 : vector<8x32xf32> to vector<8x32xbf16>
    %c0_74 = arith.constant 0 : index
    %c0_75 = arith.constant 0 : index
    %189 = vector.load %arg14[%c0_74, %c0_75] : memref<32x64xbf16, #tpu.memory_space<vmem>>, vector<32x64xbf16>
    %cst_76 = arith.constant dense<0.000000e+00> : vector<8x64xf32>
    %190 = tpu.matmul %188, %189, %cst_76 {dimension_numbers = #tpu.dot_dimension_numbers<[1], [0], [0], [1], [0, 0, 1, 1], [], []>} : vector<8x32xbf16>, vector<32x64xbf16>, vector<8x64xf32> -> vector<8x64xf32>
    %c0_77 = arith.constant 0 : index
    %c0_78 = arith.constant 0 : index
    %191 = vector.load %arg15[%c0_77, %c0_78] : memref<1x64xf32, #tpu.memory_space<vmem>>, vector<1x64xf32>
    %192 = vector.broadcast %191 : vector<1x64xf32> to vector<8x64xf32>
    %193 = arith.addf %190, %192 : vector<8x64xf32>
    %cst_79 = arith.constant 0.000000e+00 : f32
    %194 = vector.broadcast %cst_79 : f32 to vector<8x64xf32>
    %195 = arith.maximumf %193, %194 : vector<8x64xf32>
    %196 = arith.truncf %195 : vector<8x64xf32> to vector<8x64xbf16>
    %c0_80 = arith.constant 0 : index
    %c0_81 = arith.constant 0 : index
    %197 = vector.load %arg16[%c0_80, %c0_81] : memref<64x32xbf16, #tpu.memory_space<vmem>>, vector<64x32xbf16>
    %cst_82 = arith.constant dense<0.000000e+00> : vector<8x32xf32>
    %198 = tpu.matmul %196, %197, %cst_82 {dimension_numbers = #tpu.dot_dimension_numbers<[1], [0], [0], [1], [0, 0, 1, 1], [], []>} : vector<8x64xbf16>, vector<64x32xbf16>, vector<8x32xf32> -> vector<8x32xf32>
    %199 = vector.broadcast %29 : vector<1x32xf32> to vector<8x32xf32>
    %200 = arith.addf %198, %199 : vector<8x32xf32>
    %201 = arith.addf %165, %200 : vector<8x32xf32>
    %c0_83 = arith.constant 0 : index
    %c0_84 = arith.constant 0 : index
    %c0_85 = arith.constant 0 : index
    %202 = vector.load %arg17[%c0_83, %c0_84, %c0_85] : memref<1x8x32xf32, #tpu.memory_space<vmem>>, vector<1x8x32xf32>
    %203 = vector.shape_cast %202 : vector<1x8x32xf32> to vector<8x32xf32>
    %204 = vector.shape_cast %201 : vector<8x32xf32> to vector<1x8x32xf32>
    tpu.vector_store %arg17[%c0_83, %c0_84, %c0_85], %204 {strides = array<i32>} : memref<1x8x32xf32, #tpu.memory_space<vmem>>, vector<1x8x32xf32>,
    return
  }
  func.func @transform_0(%arg0: i32) -> (i32, i32, i32) {
    %c0_i32 = arith.constant 0 : i32
    %c0_i32_0 = arith.constant 0 : i32
    %c0_i32_1 = arith.constant 0 : i32
    return %arg0, %c0_i32, %c0_i32_0 : i32, i32, i32
  }
  func.func @transform_1(%arg0: i32) -> (i32, i32, i32) {
    %c0_i32 = arith.constant 0 : i32
    %c0_i32_0 = arith.constant 0 : i32
    %c0_i32_1 = arith.constant 0 : i32
    return %arg0, %c0_i32, %c0_i32_0 : i32, i32, i32
  }
  func.func @transform_2(%arg0: i32) -> (i32, i32, i32) {
    %c0_i32 = arith.constant 0 : i32
    %c0_i32_0 = arith.constant 0 : i32
    %c0_i32_1 = arith.constant 0 : i32
    return %arg0, %c0_i32, %c0_i32_0 : i32, i32, i32
  }
  func.func @transform_3(%arg0: i32) -> (i32, i32, i32) {
    %c0_i32 = arith.constant 0 : i32
    %c0_i32_0 = arith.constant 0 : i32
    %c0_i32_1 = arith.constant 0 : i32
    return %arg0, %c0_i32, %c0_i32_0 : i32, i32, i32
  }
  func.func @transform_4(%arg0: i32) -> (i32, i32) {
    %c0_i32 = arith.constant 0 : i32
    %c0_i32_0 = arith.constant 0 : i32
    %c0_i32_1 = arith.constant 0 : i32
    return %c0_i32, %c0_i32_0 : i32, i32
  }
  func.func @transform_5(%arg0: i32) -> (i32, i32) {
    %c0_i32 = arith.constant 0 : i32
    %c0_i32_0 = arith.constant 0 : i32
    %c0_i32_1 = arith.constant 0 : i32
    return %c0_i32, %c0_i32_0 : i32, i32
  }
  func.func @transform_6(%arg0: i32) -> (i32, i32) {
    %c0_i32 = arith.constant 0 : i32
    %c0_i32_0 = arith.constant 0 : i32
    %c0_i32_1 = arith.constant 0 : i32
    return %c0_i32, %c0_i32_0 : i32, i32
  }
  func.func @transform_7(%arg0: i32) -> (i32, i32) {
    %c0_i32 = arith.constant 0 : i32
    %c0_i32_0 = arith.constant 0 : i32
    %c0_i32_1 = arith.constant 0 : i32
    return %c0_i32, %c0_i32_0 : i32, i32
  }
  func.func @transform_8(%arg0: i32) -> (i32, i32) {
    %c0_i32 = arith.constant 0 : i32
    %c0_i32_0 = arith.constant 0 : i32
    %c0_i32_1 = arith.constant 0 : i32
    return %c0_i32, %c0_i32_0 : i32, i32
  }
  func.func @transform_9(%arg0: i32) -> (i32, i32) {
    %c0_i32 = arith.constant 0 : i32
    %c0_i32_0 = arith.constant 0 : i32
    %c0_i32_1 = arith.constant 0 : i32
    return %c0_i32, %c0_i32_0 : i32, i32
  }
  func.func @transform_10(%arg0: i32) -> (i32, i32) {
    %c0_i32 = arith.constant 0 : i32
    %c0_i32_0 = arith.constant 0 : i32
    %c0_i32_1 = arith.constant 0 : i32
    return %c0_i32, %c0_i32_0 : i32, i32
  }
  func.func @transform_11(%arg0: i32) -> (i32, i32) {
    %c0_i32 = arith.constant 0 : i32
    %c0_i32_0 = arith.constant 0 : i32
    %c0_i32_1 = arith.constant 0 : i32
    return %c0_i32, %c0_i32_0 : i32, i32
  }
  func.func @transform_12(%arg0: i32) -> (i32, i32) {
    %c0_i32 = arith.constant 0 : i32
    %c0_i32_0 = arith.constant 0 : i32
    %c0_i32_1 = arith.constant 0 : i32
    return %c0_i32, %c0_i32_0 : i32, i32
  }
  func.func @transform_13(%arg0: i32) -> (i32, i32) {
    %c0_i32 = arith.constant 0 : i32
    %c0_i32_0 = arith.constant 0 : i32
    %c0_i32_1 = arith.constant 0 : i32
    return %c0_i32, %c0_i32_0 : i32, i32
  }
  func.func @transform_14(%arg0: i32) -> (i32, i32) {
    %c0_i32 = arith.constant 0 : i32
    %c0_i32_0 = arith.constant 0 : i32
    %c0_i32_1 = arith.constant 0 : i32
    return %c0_i32, %c0_i32_0 : i32, i32
  }
  func.func @transform_15(%arg0: i32) -> (i32, i32) {
    %c0_i32 = arith.constant 0 : i32
    %c0_i32_0 = arith.constant 0 : i32
    %c0_i32_1 = arith.constant 0 : i32
    return %c0_i32, %c0_i32_0 : i32, i32
  }
  func.func @transform_16(%arg0: i32) -> (i32, i32, i32) {
    %c0_i32 = arith.constant 0 : i32
    %c0_i32_0 = arith.constant 0 : i32
    %c0_i32_1 = arith.constant 0 : i32
    return %arg0, %c0_i32, %c0_i32_0 : i32, i32, i32
  }
}

</mosaic_0001>

<bundles_post_ra>
// kernel: tpu_custom_call.1
= control target key start
LH: loop header
LB: loop body
LE: loop exit
PB: predicated region body
PF: predicated region fallthrough
CT: control target
= control target key end

     0   :  { %s5087_s0 = inlined_call_operand.vmem [shape: f32[2,8,32], index: 0, kind: input, shape index: {}]   ;;  %s5088_s1 = inlined_call_operand.vmem [shape: f32[2,12,32], index: 1, kind: input, shape index: {}]   ;;  %s5089_s2 = inlined_call_operand.vmem [shape: s8[2,1,12], index: 2, kind: input, shape index: {}]   ;;  %s5090_s3 = inlined_call_operand.hbm [shape: s8[2,8,8], index: 3, kind: input, shape index: {}]   ;;  %s5091_s4 = inlined_call_operand.hbm [shape: f32[6,32], index: 4, kind: input, shape index: {}]   ;;  %s5092_s5 = inlined_call_operand.hbm [shape: f32[4,32], index: 5, kind: input, shape index: {}]   ;;  %s5093_s6 = inlined_call_operand.vmem [shape: bf16[32,96], index: 6, kind: input, shape index: {}]   ;;  %s5094_s7 = inlined_call_operand.vmem [shape: f32[1,96], index: 7, kind: input, shape index: {}]   ;;  %s5095_s8 = inlined_call_operand.vmem [shape: bf16[32,32], index: 8, kind: input, shape index: {}]   ;;  %s5096_s9 = inlined_call_operand.vmem [shape: bf16[32,32], index: 9, kind: input, shape index: {}]   ;;  %s5097_s10 = inlined_call_operand.vmem [shape: bf16[32,64], index: 10, kind: input, shape index: {}]   ;;  %s5098_s11 = inlined_call_operand.vmem [shape: f32[1,64], index: 11, kind: input, shape index: {}]   ;;  %s5099_s12 = inlined_call_operand.vmem [shape: bf16[32,32], index: 12, kind: input, shape index: {}]   ;;  %s5100_s13 = inlined_call_operand.vmem [shape: bf16[32,64], index: 13, kind: input, shape index: {}]   ;;  %s5101_s14 = inlined_call_operand.vmem [shape: f32[1,64], index: 14, kind: input, shape index: {}]   ;;  %s5102_s15 = inlined_call_operand.vmem [shape: bf16[64,32], index: 15, kind: input, shape index: {}]   ;;  %s5103_s16 = inlined_call_operand.hbm [shape: f32[2,8,32], index: 16, kind: output, shape index: {}]  }
   0x1   :  { %5117 = sst [smem:[#allocation14_spill]] %s5087_s0 }
   0x2   :  { %5118 = sst [smem:[#allocation15_spill]] %s5088_s1 }
   0x3   :  { %5119 = sst [smem:[#allocation16_spill]] %s5091_s4 }
   0x4   :  { %5120 = sst [smem:[#allocation17_spill]] %s5100_s13 }
   0x5   :  { %5121 = sst [smem:[#allocation18_spill]] %s5101_s14 }
   0x6   :  { %5122 = sst [smem:[#allocation19_spill]] %s5102_s15 }
   0x7   :  { %5123 = sst [smem:[#allocation20_spill]] %s5103_s16 }
   0x8   :  { %21 = vsyncpa [#allocation3], 0 }
   0x9   :  { %23 = vsyncpa [#allocation3 + $0x1], 0 }
   0xa   :  { %24 = vsyncpa [#allocation6], 0 }
   0xb   :  { %25 = vsyncpa [#allocation4], 0 }
   0xc   :  { %27 = vsyncpa [#allocation4 + $0x1], 0  ;;  %s4323_s21 = smov 0   ;;  %s4325_s22 = smov 0  }
   0xd   :  { %s4327_s23 = smov 0   ;;  %s4329_s24 = smov 0  }
   0xe LB: > { %5124 = sst [smem:[#allocation12_spill]] %s4207_s21  ;;  %s4344_s25 = sadd.s32 4294967295, %s4219_s24   ;;  %s4219_s24 = sphi %s4329_s24, %s5156_s24   ;;  %s4215_s23 = sphi %s4327_s23, %s5155_s23   ;;  %s4211_s22 = sphi %s4325_s22, %s5154_s22   ;;  %s4207_s21 = sphi %s4323_s21, %s5153_s21  }
   0xf   : > { %s3632_s26 = sadd.s32 4294967294, %s4219_s24   ;;  %p131_p0 = scmp.ne.s32.totalorder %s4211_s22, %s4207_s21 }
  0x10   : > { %p5108_p1 = scmp.eq.s32.totalorder %s4344_s25, 0  ;;  %p413_p3 = scmp.eq.s32.totalorder %s3632_s26, 1 }
  0x11   : > { %p3633_p5 = scmp.ge.s32.totalorder %s4219_s24, 1  ;;  %p420_p7 = scmp.lt.s32.totalorder %s4219_s24, 3 }
  0x12   : > { %p4353_p4 = por %p5108_p1, %p131_p0  ;;  %p4358_p6 = por %p413_p3, %p131_p0 }
  0x13   : > { %p4363_p8 = pnand %p3633_p5, %p420_p7  ;;  %s4221_s30 = smov [#allocation5]  }
  0x14   : > { %s5125_s27 = scalar_select %p4353_p4, 1, 0 }
  0x15   : > { %s5126_s28 = scalar_select %p4358_p6, 1, 0 }
  0x16   : > { %s5128_s29 = scalar_select %p4363_p8, 1, 0 }
  0x17   : > { %5127 = sst [smem:[#allocation13_spill]] %s5126_s28  ;;  %s433_s0 = sshll.u32 %s4221_s30, 4  ;;  %s434_s0 = int_to_ptr.vmem [resolvable:$true] %s433_s0 }
  0x18   : > { %p3935_p10 = pneg %p4363_p8  ;;  %s4222_s17 = smov [#allocation7]  }
  0x19   : > { %s444_s18 = sshll.u32 %s4222_s17, 4  ;;  %s4379_s20 = sadd.s32 1, %s4219_s24   ;;  %s4376_s18 = int_to_ptr.vmem [resolvable:$true] %s444_s18 }
  0x1a   : > { %p4372_p11 = pnand %p3935_p10, %p5108_p1  ;;  %s5130_s4 = sld [smem:[#allocation16_spill]] }
  0x1c   : > { %p4065_p13 = pneg %p4372_p11 }
  0x20   : > { %s4063_s21 = scalar_lea.hbm %s5130_s4, 128 }
  0x21   : > { %p4064_p12 = scmp.ne.s32.totalorder %s5130_s4, %s4063_s21  ;;  %p4070_p5 = scmp.lt.u32.totalorder %s4063_s21, %s5130_s4 }
  0x23   : > { %p4066_p0 = pnand %p4065_p13, %p4064_p12 }
  0x25   : > { %p4067_p3 = pneg %p4066_p0 }
  0x27   : > { %p4072_p7 = pnand %p4070_p5, %p4067_p3 }
  0x29   : > { %4075 = shalt.err (!%p4072_p7)
}
  0x2a   : > { %s4076_s26 = scalar_lea.vmem %s434_s0, 128  ;;  %p4084_p2 = scmp.lt.s32.totalorder %s434_s0, %s434_s0 }
  0x2b   : > { %p4077_p10 = scmp.ne.s32.totalorder %s434_s0, %s4076_s26  ;;  %p4085_p6 = scmp.lt.s32.totalorder %s4076_s26, %s4076_s26 }
  0x2d   : > { %p4079_p9 = pnand %p4077_p10, %p4065_p13  ;;  %p4086_p4 = por %p4085_p6, %p4084_p2 }
  0x2f   : > { %p4080_p1 = pneg %p4079_p9 }
  0x31   : > { %p4087_p8 = pnand %p4086_p4, %p4080_p1 }
  0x33   : > { %4090 = shalt.err (!%p4087_p8)
}
  0x34   : > { %3938 = dma.hbm_to_vmem [thread:$0]  (!%p4372_p11), %s5130_s4, 128, %s434_s0, [#allocation6]  }
  0x35   : > { %s4091_s28 = scalar_lea.hbm %s5092_s5, 64 }
  0x36   : > { %p4092_p9 = scmp.ne.s32.totalorder %s5092_s5, %s4091_s28  ;;  %p4098_p4 = scmp.lt.u32.totalorder %s4091_s28, %s5092_s5 }
  0x38   : > { %p4094_p2 = pnand %p4092_p9, %p4065_p13 }
  0x3a   : > { %p4095_p1 = pneg %p4094_p2 }
  0x3c   : > { %p4100_p6 = pnand %p4098_p4, %p4095_p1 }
  0x3e   : > { %4103 = shalt.err (!%p4100_p6)
}
  0x3f   : > { %s4104_s0 = scalar_lea.vmem %s4376_s18, 64  ;;  %p4112_p3 = scmp.lt.s32.totalorder %s4376_s18, %s4376_s18 }
  0x40   : > { %p4105_p8 = scmp.ne.s32.totalorder %s4376_s18, %s4104_s0  ;;  %p4113_p5 = scmp.lt.s32.totalorder %s4104_s0, %s4104_s0 }
  0x42   : > { %p4107_p12 = pnand %p4105_p8, %p4065_p13  ;;  %p4114_p7 = por %p4113_p5, %p4112_p3 }
  0x44   : > { %p4108_p0 = pneg %p4107_p12 }
  0x46   : > { %p4115_p10 = pnand %p4114_p7, %p4108_p0 }
  0x48   : > { %4118 = shalt.err (!%p4115_p10)
}
  0x49   : > { %3941 = dma.hbm_to_vmem [thread:$0]  (!%p4372_p11), %s5092_s5, 64, %s4376_s18, [#allocation6]  }
  0x4a   : > { %s5131_s16 = ssub.s32 %s4219_s24, %s4379_s20  ;;  %s118_s15 = sadd.s32 1, %s4215_s23 }
  0x4b   : > { %p116_p13 = scmp.eq.s32.totalorder %s5131_s16, 0  ;;  %p125_p9 = scmp.ne.s32.totalorder %s4215_s23, %s4211_s22 }
  0x4c   : > { %p126_p2 = scmp.eq.s32.totalorder %s4219_s24, 0  ;;  %p5132_p4 = scmp.eq.s32.totalorder %s4344_s25, 1 }
  0x4d   : > { %s4438_s19 = scalar_select %p116_p13, %s4215_s23, %s118_s15  }
  0x4e   : > { %p127_p1 = por %p126_p2, %p125_p9  ;;  %p4442_p6 = por %p5132_p4, %p125_p9 }
  0x4f   : > { %p3952_p8 = scmp.lt.s32.totalorder %s4219_s24, 2  ;;  %s506_s28 = sand.u32 1, %s4215_s23  }
  0x50   : > { %s3637_s30 = sshll.u32 %s506_s28, 1  ;;  %s3638_s17 = sshll.u32 %s4219_s24, 5 }
  0x51   : > { %s4452_s18 = scalar_lea.hbm %s5090_s3, %s3638_s17  ;;  %s510_s13 = scalar_lea.vmem [#allocation2], %s3637_s30 }
  0x52   : > { %s517_s14 = sshll.u32 %s510_s13, 4  ;;  %p4456_p11 = pnand %p3952_p8, %p127_p1  ;;  %s4454_s14 = int_to_ptr.vmem [resolvable:$true] %s517_s14 }
  0x53   : > { %s507_s15 = scalar_lea.sflag [#allocation3], %s506_s28  ;;  %s4119_s4 = scalar_lea.hbm %s4452_s18, 32 }
  0x54   : > { %p4120_p12 = scmp.ne.s32.totalorder %s4452_s18, %s4119_s4  ;;  %p4121_p0 = pneg %p4456_p11 }
  0x55   : > { %s4124_s26 = scalar_lea.hbm %s5090_s3, 64  ;;  %p4125_p7 = scmp.lt.u32.totalorder %s4452_s18, %s5090_s3 }
  0x56   : > { %p4122_p3 = pnand %p4121_p0, %p4120_p12  ;;  %p4126_p10 = scmp.lt.u32.totalorder %s4124_s26, %s4119_s4 }
  0x57   : > { %p4128_p9 = scmp.lt.u32.totalorder %s4119_s4, %s4452_s18 }
  0x58   : > { %p4123_p5 = pneg %p4122_p3  ;;  %p4127_p13 = por %p4126_p10, %p4125_p7 }
  0x5a   : > { %p4129_p2 = por %p4128_p9, %p4127_p13 }
  0x5c   : > { %p4130_p1 = pnand %p4129_p2, %p4123_p5 }
  0x5e   : > { %4133 = shalt.err (!%p4130_p1)
}
  0x5f   : > { %s4134_s28 = scalar_lea.vmem %s4454_s14, 32  ;;  %s4223_s17 = smov [#allocation2]  }
  0x60   : > { %p4135_p4 = scmp.ne.s32.totalorder %s4454_s14, %s4134_s28  ;;  %s4139_s30 = sshll.u32 %s4223_s17, 4  ;;  %s4140_s30 = int_to_ptr.vmem [resolvable:$false] %s4139_s30 }
  0x61   : > { %s4141_s0 = scalar_lea.vmem %s4140_s30, 64  ;;  %p4142_p3 = scmp.lt.s32.totalorder %s4454_s14, %s4140_s30 }
  0x62   : > { %p4137_p8 = pnand %p4135_p4, %p4121_p0  ;;  %p4143_p7 = scmp.lt.s32.totalorder %s4141_s0, %s4134_s28 }
  0x64   : > { %p4138_p12 = pneg %p4137_p8  ;;  %p4144_p10 = por %p4143_p7, %p4142_p3 }
  0x66   : > { %p4145_p13 = pnand %p4144_p10, %p4138_p12 }
  0x68   : > { %4148 = shalt.err (!%p4145_p13)
}
  0x69   : > { %3945 = dma.hbm_to_vmem [thread:$0]  (!%p4456_p11), %s4452_s18, 32, %s4454_s14, %s507_s15  }
  0x6a   : > { %p5135_p5 = scmp.ne.s32.totalorder %s5128_s29, 0 }
  0x6b   : > { %s4488_s4 = sand.u32 (!%p5135_p5), 1, %s4211_s22   ;;  %p5136_p0 = scmp.ne.s32.totalorder (!%p5135_p5), %s5125_s27, 0 }
  0x6c   : > { %526 = sbr.rel (%p5135_p5) target bundleno = 4674 (0x1242), region = 84  ;;  %s3640_s26 = sshll.u32 (!%p5135_p5), %s4488_s4, 1 }
  0x6d   : > { %s529_s13 = scalar_lea.sflag (!%p5135_p5), [#allocation3], %s4488_s4  ;;  %s4492_s28 = scalar_lea.vmem (!%p5135_p5), [#allocation2], %s3640_s26 }
  0x73   : > { %4194 = dma.done.wait (%p5136_p0), %s529_s13, 32  }
  0x74   : > { %4196 = vsyncadd (%p5136_p0), %s529_s13, 4294967264  ;;  %p5137_p11 = scmp.eq.s32.totalorder %s4344_s25, 0 }
  0x76   : > { %4198 = dma.done.wait (%p5137_p11), [#allocation6], 192   ;;  %p5138_p9 = pmov %p5137_p11 }
  0x77   : > { %p601_p2 = scmp.lt.s32.totalorder %s4344_s25, 1  ;;  %s5139_s15 = sld [smem:[#allocation14_spill]]  ;;  %vm635_vm0 = vcmask 261120   ;;  %v4003_v7 = vld [vmem:[%s5093_s6] sm:$0xff]   ;;  %v4224_v8 = vmov 0.0   ;;  %vm4225_vm1 = vmmov 0   ;;  %v745_v37 = vlaneseq }
  0x78   : > { %4200 = vsyncadd (%p5138_p9), [#allocation6], 4294967104  ;;  %3767 = vmatprep.subr.bf16.mxu1 %v4224_v8  ;;  %3771 = vmatprep.mubr.msk.bf16.mxu1 %vm4225_vm1, %v4224_v8  ;;  %v4004_v9 = vld [vmem:[%s5093_s6 + $0x8] sm:$0xff]   ;;  %v3647_v18 = vld [vmem:[#allocation5] ss:$0 sm:$0xff]  ;;  %s4226_s14 = smov 104  }
  0x79   : > { %s4504_s29 = scalar_select %p601_p2, %s4344_s25, 1  ;;  %3768 = vmatpush3.bf16.msra.mxu1 %v4003_v7  ;;  %3781 = vmatprep.subr.bf16.mxu0 %v4224_v8  ;;  %v3648_v21 = vld [vmem:[#allocation5 + $0x1] ss:$0 sm:$0xff]  ;;  %v3649_v25 = vld [vmem:[%s5094_s7] ss:$0 sm:$0xff]  ;;  %v4558_v39 = vshrl.u32 %v745_v37, 7 }
  0x7a   : > { %3769 = vmatprep.subr.bf16.mxu1 %v4224_v8  ;;  %3783 = vmatprep.mubr.msk.bf16.mxu0 %vm4225_vm1, %v4224_v8  ;;  %s4227_s16 = smov 120   ;;  %v4230_v35 = vmov 1983009808   ;;  %v4231_v40 = vmov 1934713408   ;;  %v4232_v62 = vmov 0  }
  0x7b   : > { %s3644_s18 = sshll.u32 %s4504_s29, 3  ;;  %v743_v36 = vunpack.c.l.s4 %v4230_v35  ;;  %v760_v41 = vunpack.c.l.s4 %v4231_v40  ;;  %vm1243_vm4 = vcmask 64512   ;;  %vm1487_vm6 = vcmask 1043456   ;;  %s5114_s13 = smov 16  }
  0x7c   : > { %vm1818_vm7 = vcmask 130048   ;;  %vm1820_vm8 = vcmask 195584   ;;  %s3711_s27 = sshll.u32 %s4504_s29, 4  ;;  %s5140_s1 = sld [smem:[#allocation15_spill]]  ;;  %vm2865_vm12 = vcmask 97280   ;;  %vm2917_vm13 = vcmask 1045504  }
  0x7d   : > { %s604_s17 = scalar_lea.vmem %s5139_s15, %s3644_s18  ;;  %3770 = vmatpush3.bf16.msra.mxu1 %v4004_v9  ;;  %s4228_s15 = smov 112   ;;  %v744_v38 = vunpack.c.0.s8 %v743_v36  ;;  %v761_v45 = vunpack.c.0.s8 %v760_v41 }
  0x7e   : > { %v4510_v0 = vld [vmem:[%s604_s17] sm:$0xff]  ;;  %3775 = vmatprep.subr.bf16.mxu1 %v4224_v8  ;;  %s5115_s17 = smov 96   ;;  %s5113_s18 = smov 8  }
  0x7f   : > { %v636_v1 = vsel %vm635_vm0, %v4510_v0, 0.0  ;;  %v4561_v42 = vsub.s32 %v744_v38, %v4558_v39  ;;  %v4572_v51 = vsub.s32 %v761_v45, %v4558_v39  ;;  %s5147_s0 = sld [smem:[#allocation18_spill]] }
  0x80   : > { %637 = vadd.xlane.f32.xlu0 %v636_v1 }
  0x82   : > { %s609_s26 = scalar_lea.vmem %s5140_s1, %s3711_s27  ;;  %s5144_s27 = smov 24  }
 0x10d   : > { %v638_v2 = vpop.xlane.xlu0 %637 }
 0x10e   : > { %v640_v3 = vmul.f32 0.03125, %v638_v2 }
 0x110   : > { %v641_v4 = vsub.f32 %v4510_v0, %v640_v3 }
 0x112   : > { %v642_v5 = vmul.f32 %v641_v4, %v641_v4  ;;  %v658_v19 = vmul.f32 %v3647_v18, %v641_v4 }
 0x114   : > { %v643_v6 = vsel %vm635_vm0, %v642_v5, 0.0 }
 0x115   : > { %644 = vadd.xlane.f32.xlu0 %v643_v6 }
 0x1a2   : > { %v645_v10 = vpop.xlane.xlu0 %644 }
 0x1a3   : > { %v646_v11 = vmul.f32 0.032258064, %v645_v10 }
 0x1a5   : > { %4019 = vrsqrt.f32 %v646_v11  ;;  %vm649_vm2 = vcmp.eq.f32.partialorder %v646_v11, inf  ;;  %v652_v14 = vand.u32 2147483648, %v646_v11  ;;  %vm651_vm3 = vcmp.eq.f32.partialorder %v646_v11, 0.0 }
 0x1af   : > { %v4020_v12 = vpop.eup %4019 }
 0x1b0   : > { %v648_v13 = vmul.f32 %v4020_v12, %v646_v11 }
 0x1b2   : > { %v650_v15 = vsel %vm649_vm2, %v646_v11, %v648_v13 }
 0x1b3   : > { %v653_v16 = vsel %vm651_vm3, %v652_v14, %v650_v15 }
 0x1b4   : > { %v659_v17 = vadd.f32 1e-06, %v653_v16 }
 0x1b6   : > { %4021 = vrcp.f32 %v659_v17 }
 0x1c0   : > { %v4022_v20 = vpop.eup %4021 }
 0x1c1   : > { %v661_v22 = vmul.f32 %v4022_v20, %v658_v19 }
 0x1c3   : > { %v666_v23 = vadd.f32 %v3648_v21, %v661_v22 }
 0x1c5   : > { %v667_v24 = vpack.c.bf16 %v666_v23, %v666_v23 }
 0x1c7   : > { %3772 = vmatmul.mubr.msk.bf16.vlgmr.msra.gmra.mrb[0].mxu1 %vm635_vm0, %v667_v24 }
 0x1c8   : > { %3777 = vmatprep.mubr.msk.bf16.mxu1 %vm4225_vm1, %v4224_v8 }
 0x29a   : > { %v728_v26 = vpop.f32.mrb[0].mxu1 }
 0x29b   : > { %v729_v27 = vadd.f32 %v3649_v25, %v728_v26  ;;  %v3773_v28 = vpop.f32.mrb[1].mxu1 }
 0x29c   : > { %v731_v29 = vpop.f32.mrb[2].mxu1 }
 0x29d   : > { %v4536_v30 = vpack.c.bf16 %v729_v27, %v729_v27  ;;  %v3774_v31 = vpop.f32.mrb[3].mxu1 }
 0x29f   : > { %740 = vrot.lane.b32.xlu0 %v4536_v30, %s4226_s14  ;;  %736 = vrot.lane.b32.xlu1 %v4536_v30, %s4227_s16  ;;  %v748_v48 = vrot.slane %v4536_v30, %v4561_v42 }
 0x2a3   : > { %738 = vrot.lane.b32.xlu1 %v4536_v30, %s4228_s15 }
 0x2a7   : > { %903 = vrot.lane.b32.xlu1 %v4536_v30, %s5115_s17 }
 0x311   : > { %v4546_v32 = vpop.permute.xlu1 %736  ;;  %v4554_v34 = vpop.permute.xlu0 %740 }
 0x312   : > { %905 = vrot.lane.b32.xlu1 %v4546_v32, %s5115_s17  ;;  %v790_v44 = vrot.slane %v4554_v34, %v4561_v42  ;;  %v782_v46 = vrot.slane %v4546_v32, %v4561_v42 }
 0x314   : > { %v791_v52 = vcombine.low %v782_v46, %v790_v44  ;;  %v792_v54 = vcombine.high %v782_v46, %v790_v44 }
 0x315   : > { %v4550_v33 = vpop.permute.xlu1 %738 }
 0x316   : > { %907 = vrot.lane.b32.xlu1 %v4550_v33, %s5115_s17  ;;  %v756_v43 = vrot.slane %v4550_v33, %v4561_v42  ;;  %v4581_v57 = vrot.slane %v791_v52, %v4572_v51  ;;  %v4584_v59 = vrot.slane %v792_v54, %v4572_v51 }
 0x318   : > { %v757_v49 = vcombine.low %v748_v48, %v756_v43  ;;  %v758_v50 = vcombine.high %v748_v48, %v756_v43  ;;  %v807_v4 = vcombine.high %v4581_v57, %v4232_v62  ;;  %v808_v6 = vcombine.high %v4584_v59, %v4232_v62 }
 0x319   : > { %v904_v47 = vpop.permute.xlu1 %903  ;;  %v814_v13 = vshrl.u32 %v4581_v57, 16  ;;  %v830_v18 = vshrl.u32 %v4584_v59, 16 }
 0x31a   : > { %909 = vrot.lane.b32.xlu1 %v4554_v34, %s5115_s17  ;;  %v4575_v55 = vrot.slane %v757_v49, %v4572_v51  ;;  %v4578_v56 = vrot.slane %v758_v50, %v4572_v51  ;;  %v918_v60 = vrot.slane %v904_v47, %v4561_v42  ;;  %v822_v17 = vshrl.u32 %v807_v4, 16  ;;  %s5146_s17 = sld [smem:[#allocation19_spill]] }
 0x31b   : > { %v838_v21 = vshrl.u32 %v808_v6, 16 }
 0x31c   : > { %v773_v63 = vcombine.high %v4575_v55, %v4232_v62  ;;  %v774_v1 = vcombine.high %v4578_v56, %v4232_v62  ;;  %v813_v7 = vshrl.u32 %v4575_v55, 16  ;;  %v829_v11 = vshrl.u32 %v4578_v56, 16 }
 0x31e   : > { %v821_v14 = vshrl.u32 %v773_v63, 16  ;;  %v837_v15 = vshrl.u32 %v774_v1, 16  ;;  %v815_v22 = vpack.i.b16 %v814_v13, %v813_v7  ;;  %v819_v23 = vpack.i.b16 %v807_v4, %v773_v63 }
 0x31f   : > { %v831_v25 = vpack.i.b16 %v830_v18, %v829_v11  ;;  %v835_v26 = vpack.i.b16 %v808_v6, %v774_v1 }
 0x320   : > { %v823_v29 = vpack.i.b16 %v822_v17, %v821_v14  ;;  %v839_v31 = vpack.i.b16 %v838_v21, %v837_v15 }
 0x384   : > { %v906_v53 = vpop.permute.xlu1 %905 }
 0x385   : > { %v952_v12 = vrot.slane %v906_v53, %v4561_v42 }
 0x388   : > { %v908_v58 = vpop.permute.xlu1 %907 }
 0x389   : > { %v926_v61 = vrot.slane %v908_v58, %v4561_v42 }
 0x38b   : > { %v927_v2 = vcombine.low %v918_v60, %v926_v61  ;;  %v928_v3 = vcombine.high %v918_v60, %v926_v61  ;;  %v811_v60 = vpack.i.b16 %v4581_v57, %v4575_v55  ;;  %v827_v61 = vpack.i.b16 %v4584_v59, %v4578_v56 }
 0x38c   : > { %v910_v5 = vpop.permute.xlu1 %909 }
 0x38d   : > { %v935_v9 = vrot.slane %v927_v2, %v4572_v51  ;;  %v960_v10 = vrot.slane %v910_v5, %v4561_v42  ;;  %v942_v16 = vrot.slane %v928_v3, %v4572_v51  ;;  %v874_v2 = vcombine.low %v823_v29, %v839_v31 }
 0x38e   : > { %v849_v5 = vcombine.low %v819_v23, %v835_v26  ;;  %v841_v11 = vcombine.low %v811_v60, %v827_v61 }
 0x38f   : > { %v961_v19 = vcombine.low %v952_v12, %v960_v10  ;;  %v962_v20 = vcombine.high %v952_v12, %v960_v10  ;;  %v943_v24 = vcombine.high %v935_v9, %v4232_v62  ;;  %v944_v35 = vcombine.high %v942_v16, %v4232_v62 }
 0x390   : > { %v983_v36 = vshrl.u32 %v935_v9, 16  ;;  %v999_v44 = vshrl.u32 %v942_v16, 16  ;;  %v881_v13 = vrot.slane %v874_v2, %v4561_v42  ;;  %v856_v57 = vrot.slane %v849_v5, %v4561_v42 }
 0x391   : > { %v969_v27 = vrot.slane %v961_v19, %v4572_v51  ;;  %v976_v28 = vrot.slane %v962_v20, %v4572_v51  ;;  %v991_v43 = vshrl.u32 %v943_v24, 16  ;;  %v1007_v52 = vshrl.u32 %v944_v35, 16 }
 0x393   : > { %v977_v37 = vcombine.high %v969_v27, %v4232_v62  ;;  %v978_v38 = vcombine.high %v976_v28, %v4232_v62  ;;  %v981_v40 = vpack.i.b16 %v969_v27, %v935_v9  ;;  %v984_v41 = vshrl.u32 %v969_v27, 16 }
 0x394   : > { %v997_v45 = vpack.i.b16 %v976_v28, %v942_v16  ;;  %v1000_v46 = vshrl.u32 %v976_v28, 16  ;;  %v866_v9 = vcombine.low %v815_v22, %v831_v25  ;;  %v848_v16 = vrot.slane %v841_v11, %v4561_v42 }
 0x395   : > { %v985_v47 = vpack.i.b16 %v984_v41, %v983_v36  ;;  %v989_v48 = vpack.i.b16 %v977_v37, %v943_v24  ;;  %v992_v49 = vshrl.u32 %v977_v37, 16  ;;  %v1005_v50 = vpack.i.b16 %v978_v38, %v944_v35 }
 0x396   : > { %v1001_v53 = vpack.i.b16 %v1000_v46, %v999_v44  ;;  %v1008_v54 = vshrl.u32 %v978_v38, 16  ;;  %v1011_v58 = vcombine.low %v981_v40, %v997_v45  ;;  %v873_v59 = vrot.slane %v866_v9, %v4561_v42 }
 0x397   : > { %v993_v63 = vpack.i.b16 %v992_v49, %v991_v43  ;;  %v1019_v1 = vcombine.low %v989_v48, %v1005_v50  ;;  %v857_v19 = vcombine.low %v848_v16, %v856_v57 }
 0x398   : > { %v1009_v3 = vpack.i.b16 %v1008_v54, %v1007_v52  ;;  %v1036_v4 = vcombine.low %v985_v47, %v1001_v53  ;;  %v1018_v6 = vrot.slane %v1011_v58, %v4561_v42  ;;  %v882_v18 = vcombine.low %v873_v59, %v881_v13  ;;  %v617_v53 = vld [vmem:[%s4492_s28] sm:$0x3]  ;;  %s4233_s28 = smov 64  }
 0x399   : > { %v1026_v7 = vrot.slane %v1019_v1, %v4561_v42  ;;  %v864_v29 = vrot.slane %v857_v19, %v4572_v51  ;;  %v618_v54 = vunpack.c.0.s8 %v617_v53 }
 0x39a   : > { %v1044_v10 = vcombine.low %v993_v63, %v1009_v3  ;;  %v1043_v55 = vrot.slane %v1036_v4, %v4561_v42  ;;  %v889_v26 = vrot.slane %v882_v18, %v4572_v51 }
 0x39b   : > { %v1027_v12 = vcombine.low %v1018_v6, %v1026_v7  ;;  %v894_v40 = vshrl.u32 %v864_v29, 16  ;;  %v865_v47 = vcombine.high %v864_v29, %v4232_v62  ;;  %vm619_vm5 = vcmp.eq.s32.totalorder %v618_v54, 0 }
 0x39c   : > { %v1051_v56 = vrot.slane %v1044_v10, %v4561_v42  ;;  %v895_v36 = vshrl.u32 %v889_v26, 16  ;;  %v893_v38 = vpack.i.b16 %v889_v26, %v864_v29  ;;  %v890_v45 = vcombine.high %v889_v26, %v4232_v62 }
 0x39d   : > { %v1034_v14 = vrot.slane %v1027_v12, %v4572_v51  ;;  %v900_v50 = vshrl.u32 %v865_v47, 16  ;;  %v620_v60 = vsel %vm619_vm5, -1e+09, %v4224_v8 }
 0x39e   : > { %v1052_v15 = vcombine.low %v1043_v55, %v1051_v56  ;;  %v896_v44 = vpack.i.b16 %v895_v36, %v894_v40  ;;  %v901_v48 = vshrl.u32 %v890_v45, 16  ;;  %v899_v49 = vpack.i.b16 %v890_v45, %v865_v47 }
 0x39f   : > { %v1064_v21 = vshrl.u32 %v1034_v14, 16  ;;  %v1035_v27 = vcombine.high %v1034_v14, %v4232_v62 }
 0x3a0   : > { %v1059_v17 = vrot.slane %v1052_v15, %v4572_v51  ;;  %v902_v52 = vpack.i.b16 %v901_v48, %v900_v50 }
 0x3a1   : > { %v1070_v37 = vshrl.u32 %v1035_v27, 16 }
 0x3a2   : > { %v1063_v20 = vpack.i.b16 %v1059_v17, %v1034_v14  ;;  %v1065_v22 = vshrl.u32 %v1059_v17, 16  ;;  %v1060_v23 = vcombine.high %v1059_v17, %v4232_v62 }
 0x3a4   : > { %v1248_v24 = vsel %vm1243_vm4, %v1063_v20, 0  ;;  %v1066_v25 = vpack.i.b16 %v1065_v22, %v1064_v21  ;;  %v1071_v31 = vshrl.u32 %v1060_v23, 16  ;;  %v1069_v35 = vpack.i.b16 %v1060_v23, %v1035_v27 }
 0x3a5   : > { %3776 = vmatpush3.bf16.xpose.msra.mxu1 %v1248_v24 }
 0x3a6   : > { %v1294_v28 = vsel %vm1243_vm4, %v1066_v25, 0  ;;  %3787 = vmatprep.subr.bf16.mxu1 %v4224_v8  ;;  %v1072_v41 = vpack.i.b16 %v1071_v31, %v1070_v37  ;;  %v1340_v43 = vsel %vm1243_vm4, %v1069_v35, 0 }
 0x3a7   : > { %3782 = vmatpush3.bf16.xpose.msra.mxu0 %v1294_v28 }
 0x3a8   : > { %3793 = vmatprep.subr.bf16.mxu0 %v4224_v8  ;;  %v1386_v46 = vsel %vm1243_vm4, %v1072_v41, 0 }
 0x3ac   : > { %3778 = vmatmul.mubr.msk.bf16.vlgmr.msra.gmra.mrb[4].mxu1 %vm1243_vm4, %v893_v38 }
 0x3ad   : > { %3788 = vmatpush3.bf16.xpose.msra.mxu1 %v1340_v43  ;;  %3789 = vmatprep.mubr.msk.bf16.mxu1 %vm4225_vm1, %v4224_v8 }
 0x3ae   : > { %3784 = vmatmul.mubr.msk.bf16.vlgmr.msra.gmra.mrb[0].mxu0 %vm1243_vm4, %v896_v44  ;;  %3799 = vmatprep.subr.bf16.mxu1 %v4224_v8 }
 0x3af   : > { %3794 = vmatpush3.bf16.xpose.msra.mxu0 %v1386_v46  ;;  %3795 = vmatprep.mubr.msk.bf16.mxu0 %vm4225_vm1, %v4224_v8 }
 0x3b0   : > { %3805 = vmatprep.subr.bf16.mxu0 %v4224_v8 }
 0x3b4   : > { %3790 = vmatmul.mubr.msk.bf16.vlgmr.msra.gmra.mrb[8].mxu1 %vm1243_vm4, %v899_v49 }
 0x3b5   : > { %3801 = vmatprep.mubr.msk.bf16.mxu1 %vm4225_vm1, %v4224_v8 }
 0x3b6   : > { %3796 = vmatmul.mubr.msk.bf16.vlgmr.msra.gmra.mrb[4].mxu0 %vm1243_vm4, %v902_v52 }
 0x3b7   : > { %3807 = vmatprep.mubr.msk.bf16.mxu0 %vm4225_vm1, %v4224_v8 }
 0x47f   : > { %v1284_v58 = vpop.f32.mrb[4].mxu1 }
 0x480   : > { %v1428_v61 = vmul.f32 0.35355338, %v1284_v58  ;;  %v3779_v63 = vpop.f32.mrb[5].mxu1 }
 0x481   : > { %v1287_v1 = vpop.f32.mrb[6].mxu1  ;;  %v1330_v2 = vpop.f32.mrb[0].mxu0 }
 0x482   : > { %v1429_v3 = vmul.f32 0.35355338, %v1330_v2  ;;  %v3780_v4 = vpop.f32.mrb[7].mxu1  ;;  %v3785_v5 = vpop.f32.mrb[1].mxu0  ;;  %v1432_v6 = vadd.f32 %v1428_v61, %v620_v60 }
 0x483   : > { %v1333_v7 = vpop.f32.mrb[2].mxu0 }
 0x484   : > { %v3786_v9 = vpop.f32.mrb[3].mxu0  ;;  %v1436_v10 = vsel %vm1243_vm4, %v1432_v6, -inf  ;;  %v1433_v11 = vadd.f32 %v1429_v3, %v620_v60 }
 0x485   : > { %1437 = vmax.xlane.f32.xlu1 %v1436_v10 }
 0x486   : > { %v1439_v12 = vsel %vm1243_vm4, %v1433_v11, -inf }
 0x487   : > { %1440 = vmax.xlane.f32.xlu0 %v1439_v12  ;;  %v1376_v13 = vpop.f32.mrb[8].mxu1 }
 0x488   : > { %v1430_v55 = vmul.f32 0.35355338, %v1376_v13  ;;  %v3791_v56 = vpop.f32.mrb[9].mxu1 }
 0x489   : > { %v1379_v57 = vpop.f32.mrb[10].mxu1  ;;  %v1422_v59 = vpop.f32.mrb[4].mxu0 }
 0x48a   : > { %v1431_v14 = vmul.f32 0.35355338, %v1422_v59  ;;  %v3792_v15 = vpop.f32.mrb[11].mxu1  ;;  %v3797_v16 = vpop.f32.mrb[5].mxu0  ;;  %v1434_v17 = vadd.f32 %v1430_v55, %v620_v60 }
 0x48b   : > { %v1425_v18 = vpop.f32.mrb[6].mxu0 }
 0x48c   : > { %v3798_v19 = vpop.f32.mrb[7].mxu0  ;;  %v1442_v20 = vsel %vm1243_vm4, %v1434_v17, -inf  ;;  %v1435_v21 = vadd.f32 %v1431_v14, %v620_v60 }
 0x48d   : > { %1443 = vmax.xlane.f32.xlu1 %v1442_v20 }
 0x48e   : > { %v1445_v22 = vsel %vm1243_vm4, %v1435_v21, -inf }
 0x48f   : > { %1446 = vmax.xlane.f32.xlu0 %v1445_v22 }
 0x49e   : > { %1073 = vrot.lane.b32.xlu1 %v4536_v30, %s4233_s28 }
 0x512   : > { %v1438_v23 = vpop.xlane.xlu1 %1437 }
 0x513   : > { %v1448_v24 = vsub.f32 %v1432_v6, %v1438_v23 }
 0x514   : > { %v1441_v25 = vpop.xlane.xlu0 %1440 }
 0x515   : > { %v1452_v26 = vmul.f32 1.442695, %v1448_v24  ;;  %v1449_v27 = vsub.f32 %v1433_v11, %v1441_v25 }
 0x517   : > { %4023 = vpow2.f32 %v1452_v26  ;;  %v1454_v28 = vmul.f32 1.442695, %v1449_v27 }
 0x519   : > { %4025 = vpow2.f32 %v1454_v28 }
 0x51a   : > { %v1444_v30 = vpop.xlane.xlu1 %1443 }
 0x51b   : > { %v1450_v38 = vsub.f32 %v1434_v17, %v1444_v30 }
 0x51c   : > { %v1447_v37 = vpop.xlane.xlu0 %1446 }
 0x51d   : > { %v1451_v40 = vsub.f32 %v1435_v21, %v1447_v37  ;;  %v1456_v41 = vmul.f32 1.442695, %v1450_v38 }
 0x51f   : > { %v1458_v43 = vmul.f32 1.442695, %v1451_v40  ;;  %4027 = vpow2.f32 %v1456_v41 }
 0x521   : > { %v4657_v29 = vpop.eup %4023  ;;  %4029 = vpow2.f32 %v1458_v43 }
 0x522   : > { %v1460_v31 = vsel %vm1243_vm4, %v4657_v29, 0.0 }
 0x523   : > { %v4661_v35 = vpop.eup %4025  ;;  %1461 = vadd.xlane.f32.xlu1 %v1460_v31 }
 0x524   : > { %v1463_v36 = vsel %vm1243_vm4, %v4661_v35, 0.0 }
 0x525   : > { %1464 = vadd.xlane.f32.xlu0 %v1463_v36 }
 0x529   : > { %v4668_v44 = vpop.eup %4027 }
 0x52a   : > { %v1466_v46 = vsel %vm1243_vm4, %v4668_v44, 0.0 }
 0x52b   : > { %v4670_v45 = vpop.eup %4029 }
 0x534   : > { %1077 = vrot.lane.b32.xlu1 %v4550_v33, %s4233_s28  ;;  %v1469_v33 = vsel %vm1243_vm4, %v4670_v45, 0.0 }
 0x538   : > { %1079 = vrot.lane.b32.xlu1 %v4554_v34, %s4233_s28 }
 0x53b   : > { %1075 = vrot.lane.b32.xlu0 %v4546_v32, %s4233_s28  ;;  %v1074_v32 = vpop.permute.xlu1 %1073  ;;  %s5112_s28 = smov 24  }
 0x53c   : > { %v1088_v49 = vrot.slane %v1074_v32, %v4561_v42 }
 0x55a   : > { %1467 = vadd.xlane.f32.xlu0 %v1466_v46 }
 0x55c   : > { %1470 = vadd.xlane.f32.xlu1 %v1469_v33 }
 0x5b0   : > { %v1462_v34 = vpop.xlane.xlu1 %1461 }
 0x5b1   : > { %4031 = vrcp.f32 %v1462_v34 }
 0x5b2   : > { %v1465_v47 = vpop.xlane.xlu0 %1464 }
 0x5b3   : > { %4033 = vrcp.f32 %v1465_v47 }
 0x5b4   : > { %v1078_v48 = vpop.permute.xlu1 %1077 }
 0x5b5   : > { %v1096_v50 = vrot.slane %v1078_v48, %v4561_v42 }
 0x5b6   : > { %v1076_v54 = vpop.permute.xlu0 %1075 }
 0x5b7   : > { %v1097_v52 = vcombine.low %v1088_v49, %v1096_v50  ;;  %v1098_v53 = vcombine.high %v1088_v49, %v1096_v50  ;;  %v1122_v63 = vrot.slane %v1076_v54, %v4561_v42 }
 0x5b8   : > { %v1080_v58 = vpop.permute.xlu1 %1079 }
 0x5b9   : > { %v1105_v60 = vrot.slane %v1097_v52, %v4572_v51  ;;  %v1130_v61 = vrot.slane %v1080_v58, %v4561_v42  ;;  %v1112_v1 = vrot.slane %v1098_v53, %v4572_v51 }
 0x5bb   : > { %v1131_v2 = vcombine.low %v1122_v63, %v1130_v61  ;;  %v1132_v3 = vcombine.high %v1122_v63, %v1130_v61  ;;  %v1113_v4 = vcombine.high %v1105_v60, %v4232_v62  ;;  %v1114_v7 = vcombine.high %v1112_v1, %v4232_v62  ;;  %v4032_v31 = vpop.eup %4031 }
 0x5bc   : > { %v1153_v9 = vshrl.u32 %v1105_v60, 16  ;;  %v1169_v56 = vshrl.u32 %v1112_v1, 16  ;;  %v1476_v33 = vmul.f32 %v4032_v31, %v4657_v29 }
 0x5bd   : > { %v1139_v5 = vrot.slane %v1131_v2, %v4572_v51  ;;  %v1146_v6 = vrot.slane %v1132_v3, %v4572_v51  ;;  %v1161_v55 = vshrl.u32 %v1113_v4, 16  ;;  %v1177_v18 = vshrl.u32 %v1114_v7, 16  ;;  %v4034_v30 = vpop.eup %4033 }
 0x5be   : > { %v1477_v49 = vmul.f32 %v4034_v30, %v4661_v35  ;;  %v1480_v61 = vpack.c.bf16 %v1476_v33, %v1476_v33 }
 0x5bf   : > { %v1147_v10 = vcombine.high %v1139_v5, %v4232_v62  ;;  %v1148_v11 = vcombine.high %v1146_v6, %v4232_v62  ;;  %v1151_v12 = vpack.i.b16 %v1139_v5, %v1105_v60  ;;  %v1154_v13 = vshrl.u32 %v1139_v5, 16 }
 0x5c0   : > { %v1167_v57 = vpack.i.b16 %v1146_v6, %v1112_v1  ;;  %v1170_v59 = vshrl.u32 %v1146_v6, 16  ;;  %v1481_v1 = vpack.c.bf16 %v1477_v49, %v1477_v49 }
 0x5c1   : > { %v1155_v14 = vpack.i.b16 %v1154_v13, %v1153_v9  ;;  %v1159_v15 = vpack.i.b16 %v1147_v10, %v1113_v4  ;;  %v1162_v16 = vshrl.u32 %v1147_v10, 16  ;;  %v1175_v17 = vpack.i.b16 %v1148_v11, %v1114_v7 }
 0x5c2   : > { %v1171_v19 = vpack.i.b16 %v1170_v59, %v1169_v56  ;;  %v1178_v20 = vshrl.u32 %v1148_v11, 16  ;;  %v1181_v21 = vcombine.low %v1151_v12, %v1167_v57 }
 0x5c3   : > { %v1163_v22 = vpack.i.b16 %v1162_v16, %v1161_v55  ;;  %v1189_v23 = vcombine.low %v1159_v15, %v1175_v17 }
 0x5c4   : > { %v1179_v24 = vpack.i.b16 %v1178_v20, %v1177_v18  ;;  %v1206_v25 = vcombine.low %v1155_v14, %v1171_v19  ;;  %v1188_v26 = vrot.slane %v1181_v21, %v4561_v42 }
 0x5c5   : > { %v1196_v27 = vrot.slane %v1189_v23, %v4561_v42 }
 0x5c6   : > { %v1214_v28 = vcombine.low %v1163_v22, %v1179_v24  ;;  %v1213_v37 = vrot.slane %v1206_v25, %v4561_v42 }
 0x5c7   : > { %v1197_v36 = vcombine.low %v1188_v26, %v1196_v27 }
 0x5c8   : > { %v1221_v38 = vrot.slane %v1214_v28, %v4561_v42 }
 0x5c9   : > { %v1204_v40 = vrot.slane %v1197_v36, %v4572_v51 }
 0x5ca   : > { %v1222_v41 = vcombine.low %v1213_v37, %v1221_v38  ;;  %v4005_v38 = vld [vmem:[%s5095_s8] sm:$0xff]  }
 0x5cb   : > { %v1205_v43 = vcombine.high %v1204_v40, %v4232_v62  ;;  %v1234_v34 = vshrl.u32 %v1204_v40, 16 }
 0x5cc   : > { %v1229_v46 = vrot.slane %v1222_v41, %v4572_v51 }
 0x5cd   : > { %v1240_v50 = vshrl.u32 %v1205_v43, 16 }
 0x5ce   : > { %v1233_v32 = vpack.i.b16 %v1229_v46, %v1204_v40  ;;  %v1235_v47 = vshrl.u32 %v1229_v46, 16  ;;  %v1230_v48 = vcombine.high %v1229_v46, %v4232_v62 }
 0x5d0   : > { %v1489_v52 = vsel %vm1487_vm6, %v1233_v32, 0  ;;  %v1236_v53 = vpack.i.b16 %v1235_v47, %v1234_v34  ;;  %v1239_v54 = vpack.i.b16 %v1230_v48, %v1205_v43  ;;  %v1241_v58 = vshrl.u32 %v1230_v48, 16  ;;  %v4006_v48 = vld [vmem:[%s5095_s8 + $0x8] sm:$0xff]  }
 0x5d1   : > { %3800 = vmatpush3.bf16.msra.mxu1 %v1489_v52 }
 0x5d2   : > { %v1535_v60 = vsel %vm1487_vm6, %v1236_v53, 0  ;;  %3811 = vmatprep.subr.bf16.mxu1 %v4224_v8  ;;  %v1242_v29 = vpack.i.b16 %v1241_v58, %v1240_v50  ;;  %v1581_v63 = vsel %vm1487_vm6, %v1239_v54, 0 }
 0x5d3   : > { %3806 = vmatpush3.bf16.msra.mxu0 %v1535_v60 }
 0x5d4   : > { %3802 = vmatmul.mubr.msk.bf16.vlgmr.msra.gmra.mrb[12].mxu1 %vm1243_vm4, %v1480_v61  ;;  %3817 = vmatprep.subr.bf16.mxu0 %v4224_v8  ;;  %v1627_v35 = vsel %vm1487_vm6, %v1242_v29, 0 }
 0x5d5   : > { %3812 = vmatpush3.bf16.msra.mxu1 %v1581_v63  ;;  %3813 = vmatprep.mubr.msk.bf16.mxu1 %vm4225_vm1, %v4224_v8 }
 0x5d6   : > { %3808 = vmatmul.mubr.msk.bf16.vlgmr.msra.gmra.mrb[8].mxu0 %vm1243_vm4, %v1481_v1  ;;  %3823 = vmatprep.subr.bf16.mxu1 %v4224_v8 }
 0x5d7   : > { %3818 = vmatpush3.bf16.msra.mxu0 %v1627_v35  ;;  %3819 = vmatprep.mubr.msk.bf16.mxu0 %vm4225_vm1, %v4224_v8 }
 0x5d8   : > { %3831 = vmatprep.subr.bf16.mxu0 %v4224_v8 }
 0x5e7   : > { %v1468_v2 = vpop.xlane.xlu0 %1467 }
 0x5e8   : > { %4035 = vrcp.f32 %v1468_v2 }
 0x5e9   : > { %v1471_v3 = vpop.xlane.xlu1 %1470 }
 0x5ea   : > { %4037 = vrcp.f32 %v1471_v3 }
 0x5f2   : > { %v4036_v4 = vpop.eup %4035 }
 0x5f3   : > { %v1478_v5 = vmul.f32 %v4036_v4, %v4668_v44 }
 0x5f4   : > { %v4038_v6 = vpop.eup %4037 }
 0x5f5   : > { %v1479_v7 = vmul.f32 %v4038_v6, %v4670_v45  ;;  %v1482_v9 = vpack.c.bf16 %v1478_v5, %v1478_v5 }
 0x5f7   : > { %3814 = vmatmul.mubr.msk.bf16.vlgmr.msra.gmra.mrb[16].mxu1 %vm1243_vm4, %v1482_v9  ;;  %v1483_v10 = vpack.c.bf16 %v1479_v7, %v1479_v7 }
 0x5f8   : > { %3827 = vmatprep.mubr.msk.bf16.mxu1 %vm4225_vm1, %v4224_v8  ;;  %3824 = vmatpush3.bf16.msra.mxu1 %v4005_v38 }
 0x5f9   : > { %3820 = vmatmul.mubr.msk.bf16.vlgmr.msra.gmra.mrb[12].mxu0 %vm1243_vm4, %v1483_v10  ;;  %3825 = vmatprep.subr.bf16.mxu1 %v4224_v8 }
 0x5fa   : > { %3835 = vmatprep.mubr.msk.bf16.mxu0 %vm4225_vm1, %v4224_v8 }
 0x5fc   : > { %3826 = vmatpush3.bf16.msra.mxu1 %v4006_v48 }
 0x5fd   : > { %3839 = vmatprep.subr.bf16.mxu1 %v4224_v8 }
 0x6a7   : > { %v1525_v11 = vpop.f32.mrb[12].mxu1 }
 0x6a8   : > { %v3803_v12 = vpop.f32.mrb[13].mxu1 }
 0x6a9   : > { %v1528_v13 = vpop.f32.mrb[14].mxu1  ;;  %v1571_v55 = vpop.f32.mrb[8].mxu0 }
 0x6aa   : > { %v3804_v44 = vpop.f32.mrb[15].mxu1  ;;  %v3809_v56 = vpop.f32.mrb[9].mxu0 }
 0x6ab   : > { %v1574_v57 = vpop.f32.mrb[10].mxu0 }
 0x6ac   : > { %v3810_v45 = vpop.f32.mrb[11].mxu0 }
 0x6ca   : > { %v1617_v59 = vpop.f32.mrb[16].mxu1 }
 0x6cb   : > { %v1669_v14 = vcombine.low %v1525_v11, %v1617_v59  ;;  %v1670_v15 = vcombine.high %v1525_v11, %v1617_v59  ;;  %v3815_v16 = vpop.f32.mrb[17].mxu1 }
 0x6cc   : > { %v1620_v17 = vpop.f32.mrb[18].mxu1  ;;  %v1663_v18 = vpop.f32.mrb[12].mxu0  ;;  %v4007_v16 = vld [vmem:[%s5097_s10] sm:$0xff]  }
 0x6cd   : > { %v1685_v19 = vcombine.low %v1571_v55, %v1663_v18  ;;  %v1686_v20 = vcombine.high %v1571_v55, %v1663_v18  ;;  %v3816_v21 = vpop.f32.mrb[19].mxu1  ;;  %v3821_v22 = vpop.f32.mrb[13].mxu0  ;;  %v1677_v24 = vrot.slane %v1669_v14, %v4561_v42  ;;  %v1684_v25 = vrot.slane %v1670_v15, %v4561_v42  ;;  %v3663_v55 = vld [vmem:[#allocation7] ss:$0 sm:$0xff]  ;;  %v615_v17 = vld [vmem:[%s609_s26] sm:$0xff] }
 0x6ce   : > { %v1666_v23 = vpop.f32.mrb[14].mxu0  ;;  %v616_v18 = vld [vmem:[%s609_s26 + $0x8] sm:$0xf]  ;;  %s3643_s26 = sshll.u32 %s4488_s4, 3 }
 0x6cf   : > { %v1693_v26 = vrot.slane %v1685_v19, %v4561_v42  ;;  %v1700_v27 = vrot.slane %v1686_v20, %v4561_v42  ;;  %v3822_v28 = vpop.f32.mrb[15].mxu0  ;;  %v1981_v19 = vpack.c.bf16 %v616_v18, %v615_v17 }
 0x6d1   : > { %v1701_v31 = vcombine.low %v1677_v24, %v1693_v26  ;;  %v1702_v36 = vcombine.high %v1677_v24, %v1693_v26  ;;  %v1717_v30 = vcombine.low %v1684_v25, %v1700_v27  ;;  %v1718_v37 = vcombine.high %v1684_v25, %v1700_v27  ;;  %v4009_v25 = vld [vmem:[%s5096_s9] sm:$0xff]   ;;  %v4010_v26 = vld [vmem:[%s5096_s9 + $0x8] sm:$0xff]  }
 0x6d2   : > { %3832 = vmatpush3.bf16.msra.mxu0 %v4009_v25  ;;  %v3673_v27 = vld [vmem:[%s5098_s11] ss:$0 sm:$0xff] }
 0x6d3   : > { %v1709_v40 = vrot.slane %v1701_v31, %v4572_v51  ;;  %v1716_v41 = vrot.slane %v1702_v36, %v4572_v51  ;;  %v1725_v43 = vrot.slane %v1717_v30, %v4572_v51  ;;  %v1732_v46 = vrot.slane %v1718_v37, %v4572_v51  ;;  %3833 = vmatprep.subr.bf16.mxu0 %v4224_v8 }
 0x6d5   : > { %v1737_v33 = vcombine.low %v1709_v40, %v1716_v41  ;;  %v3661_v32 = vcombine.high %v1709_v40, %v1716_v41  ;;  %v1753_v34 = vcombine.low %v1725_v43, %v1732_v46  ;;  %v3662_v47 = vcombine.high %v1725_v43, %v1732_v46 }
 0x6d6   : > { %3834 = vmatpush3.bf16.msra.mxu0 %v4010_v26 }
 0x6d7   : > { %v1744_v49 = vrot.slane %v1737_v33, %v4561_v42  ;;  %v1752_v50 = vrot.slane %v3661_v32, %v4561_v42  ;;  %v1760_v52 = vrot.slane %v1753_v34, %v4561_v42  ;;  %v1768_v53 = vrot.slane %v3662_v47, %v4561_v42  ;;  %3847 = vmatprep.subr.bf16.mxu0 %v4224_v8 }
 0x6d9   : > { %v1770_v54 = vcombine.high %v1744_v49, %v1752_v50  ;;  %v1786_v58 = vcombine.high %v1760_v52, %v1768_v53  ;;  %v1769_v60 = vcombine.low %v1744_v49, %v1752_v50  ;;  %v1785_v61 = vcombine.low %v1760_v52, %v1768_v53  ;;  %v3667_v49 = vld [vmem:[#allocation5 + $0x2] ss:$0 sm:$0xff]  ;;  %v3668_v53 = vld [vmem:[#allocation5 + $0x3] ss:$0 sm:$0xff] }
 0x6db   : > { %v1784_v29 = vrot.slane %v1770_v54, %v4572_v51  ;;  %v1800_v63 = vrot.slane %v1786_v58, %v4572_v51  ;;  %v1777_v1 = vrot.slane %v1769_v60, %v4572_v51  ;;  %v1793_v35 = vrot.slane %v1785_v61, %v4572_v51 }
 0x6dd   : > { %v1803_v2 = vcombine.low %v1784_v29, %v1800_v63  ;;  %v1802_v3 = vcombine.high %v1777_v1, %v1793_v35  ;;  %v1804_v4 = vcombine.high %v1784_v29, %v1800_v63  ;;  %v1801_v5 = vcombine.low %v1777_v1, %v1793_v35 }
 0x6df   : > { %1810 = vrot.lane.b32.xlu1 %v1803_v2, %s5114_s13  ;;  %1806 = vrot.lane.b32.xlu0 %v1802_v3, %s5113_s18  ;;  %s5142_s18 = smov 16   ;;  %s3708_s13 = sshll.u32 %s4344_s25, 7 }
 0x6e0   : > { %s3497_s25 = scalar_lea.sflag [#allocation4], %s4488_s4 }
 0x6e3   : > { %1814 = vrot.lane.b32.xlu0 %v1804_v4, %s5112_s28  ;;  %s5143_s28 = smov 8  }
 0x751   : > { %v1807_v6 = vpop.permute.xlu0 %1806  ;;  %v1811_v7 = vpop.permute.xlu1 %1810 }
 0x752   : > { %v1817_v9 = vsel %vm1243_vm4, %v1801_v5, %v1807_v6 }
 0x753   : > { %v1819_v11 = vsel %vm1818_vm7, %v1817_v9, %v1811_v7 }
 0x755   : > { %v1815_v10 = vpop.permute.xlu0 %1814 }
 0x756   : > { %v1821_v12 = vsel %vm1820_vm8, %v1819_v11, %v1815_v10 }
 0x757   : > { %v1822_v13 = vpack.c.bf16 %v1821_v12, %v1821_v12 }
 0x759   : > { %3828 = vmatmul.mubr.msk.bf16.vlgmr.msra.gmra.mrb[20].mxu1 %vm635_vm0, %v1822_v13 }
 0x75a   : > { %3843 = vmatprep.mubr.msk.bf16.mxu1 %vm4225_vm1, %v4224_v8  ;;  %3840 = vmatpush3.bf16.msra.mxu1 %v4007_v16 }
 0x75b   : > { %3841 = vmatprep.subr.bf16.mxu1 %v4224_v8 }
 0x82c   : > { %v1880_v44 = vpop.f32.mrb[20].mxu1 }
 0x82d   : > { %v1881_v56 = vadd.f32 %v3663_v55, %v1880_v44  ;;  %v3829_v57 = vpop.f32.mrb[21].mxu1 }
 0x82e   : > { %v1883_v45 = vpop.f32.mrb[22].mxu1 }
 0x82f   : > { %v4754_v59 = vadd.f32 %v1881_v56, %v4510_v0  ;;  %v3830_v14 = vpop.f32.mrb[23].mxu1  ;;  %v4008_v0 = vld [vmem:[%s5097_s10 + $0x8] sm:$0xff]  }
 0x830   : > { %3842 = vmatpush3.bf16.msra.mxu1 %v4008_v0 }
 0x831   : > { %v1887_v15 = vsel %vm635_vm0, %v4754_v59, 0.0  ;;  %3853 = vmatprep.subr.bf16.mxu1 %v4224_v8 }
 0x832   : > { %1888 = vadd.xlane.f32.xlu1 %v1887_v15 }
 0x833   : > { %3844 = vmatmul.mubr.msk.bf16.vlgmr.msra.gmra.mrb[24].mxu1 %vm635_vm0, %v1981_v19 }
 0x834   : > { %3855 = vmatprep.mubr.msk.bf16.mxu1 %vm4225_vm1, %v4224_v8 }
 0x8bf   : > { %v1889_v20 = vpop.xlane.xlu1 %1888 }
 0x8c0   : > { %v1890_v21 = vmul.f32 0.03125, %v1889_v20 }
 0x8c2   : > { %v1891_v22 = vsub.f32 %v4754_v59, %v1890_v21 }
 0x8c4   : > { %v1892_v23 = vmul.f32 %v1891_v22, %v1891_v22  ;;  %v1908_v50 = vmul.f32 %v3667_v49, %v1891_v22 }
 0x8c6   : > { %v1893_v24 = vsel %vm635_vm0, %v1892_v23, 0.0 }
 0x8c7   : > { %1894 = vadd.xlane.f32.xlu0 %v1893_v24 }
 0x906   : > { %v2042_v28 = vpop.f32.mrb[24].mxu1 }
 0x907   : > { %v2043_v31 = vadd.f32 %v3673_v27, %v2042_v28  ;;  %v3845_v36 = vpop.f32.mrb[25].mxu1 }
 0x908   : > { %v2045_v30 = vpop.f32.mrb[26].mxu1 }
 0x909   : > { %v2046_v37 = vadd.f32 %v3673_v27, %v2045_v30  ;;  %v3846_v38 = vpop.f32.mrb[27].mxu1 }
 0x90b   : > { %v4786_v40 = vpack.c.bf16 %v2046_v37, %v2043_v31 }
 0x90d   : > { %2223 = vrot.lane.b32.xlu1 %v4786_v40, %s4228_s15  ;;  %2220 = vrot.lane.b32.xlu0 %v4786_v40, %s4227_s16  ;;  %v2235_v1 = vrot.slane %v4786_v40, %v4561_v42 }
 0x911   : > { %2226 = vrot.lane.b32.xlu1 %v4786_v40, %s4226_s14 }
 0x954   : > { %v1895_v41 = vpop.xlane.xlu0 %1894 }
 0x955   : > { %v1896_v43 = vmul.f32 0.032258064, %v1895_v41 }
 0x957   : > { %4039 = vrsqrt.f32 %v1896_v43  ;;  %vm1899_vm9 = vcmp.eq.f32.partialorder %v1896_v43, inf  ;;  %v1902_v32 = vand.u32 2147483648, %v1896_v43  ;;  %vm1901_vm10 = vcmp.eq.f32.partialorder %v1896_v43, 0.0 }
 0x961   : > { %v4040_v46 = vpop.eup %4039 }
 0x962   : > { %v1898_v33 = vmul.f32 %v4040_v46, %v1896_v43 }
 0x964   : > { %v1900_v34 = vsel %vm1899_vm9, %v1896_v43, %v1898_v33 }
 0x965   : > { %v1903_v47 = vsel %vm1901_vm10, %v1902_v32, %v1900_v34 }
 0x966   : > { %v1909_v48 = vadd.f32 1e-06, %v1903_v47 }
 0x968   : > { %4041 = vrcp.f32 %v1909_v48 }
 0x972   : > { %v4042_v52 = vpop.eup %4041 }
 0x973   : > { %v1911_v54 = vmul.f32 %v4042_v52, %v1908_v50 }
 0x975   : > { %v1916_v58 = vadd.f32 %v3668_v53, %v1911_v54 }
 0x977   : > { %v1917_v60 = vpack.c.bf16 %v1916_v58, %v1916_v58 }
 0x979   : > { %3836 = vmatmul.mubr.msk.bf16.vlgmr.msra.gmra.mrb[16].mxu0 %vm635_vm0, %v1917_v60 }
 0x97a   : > { %3849 = vmatprep.mubr.msk.bf16.mxu0 %vm4225_vm1, %v4224_v8 }
 0x97f   : > { %v4797_v61 = vpop.permute.xlu1 %2223  ;;  %v4801_v63 = vpop.permute.xlu0 %2220 }
 0x980   : > { %v2243_v35 = vrot.slane %v4797_v61, %v4561_v42  ;;  %v2278_v3 = vrot.slane %v4801_v63, %v4561_v42  ;;  %v3677_v13 = vcombine.high %v4786_v40, %v4797_v61 }
 0x982   : > { %v2245_v4 = vcombine.low %v2235_v1, %v2243_v35  ;;  %v2246_v5 = vcombine.high %v2235_v1, %v2243_v35  ;;  %v2268_v14 = vrot.slane %v3677_v13, %v4572_v51 }
 0x983   : > { %v4799_v29 = vpop.permute.xlu1 %2226 }
 0x984   : > { %v2286_v2 = vrot.slane %v4799_v29, %v4561_v42  ;;  %v2253_v9 = vrot.slane %v2245_v4, %v4572_v51  ;;  %v2260_v10 = vrot.slane %v2246_v5, %v4572_v51  ;;  %v3678_v55 = vcombine.high %v4801_v63, %v4799_v29 }
 0x985   : > { %v2271_v23 = vcombine.high %v2268_v14, %v4232_v62  ;;  %v2350_v27 = vshrl.u32 %v2268_v14, 16 }
 0x986   : > { %v2288_v6 = vcombine.low %v2278_v3, %v2286_v2  ;;  %v2289_v7 = vcombine.high %v2278_v3, %v2286_v2  ;;  %v2269_v44 = vcombine.high %v2253_v9, %v4232_v62  ;;  %v2270_v56 = vcombine.high %v2260_v10, %v4232_v62 }
 0x987   : > { %v2311_v15 = vrot.slane %v3678_v55, %v4572_v51  ;;  %v2319_v16 = vshrl.u32 %v2253_v9, 16  ;;  %v2335_v17 = vshrl.u32 %v2260_v10, 16  ;;  %v2356_v43 = vshrl.u32 %v2271_v23, 16 }
 0x988   : > { %v2296_v11 = vrot.slane %v2288_v6, %v4572_v51  ;;  %v2303_v12 = vrot.slane %v2289_v7, %v4572_v51  ;;  %v2327_v0 = vshrl.u32 %v2269_v44, 16  ;;  %v2343_v19 = vshrl.u32 %v2270_v56, 16 }
 0x989   : > { %v2314_v24 = vcombine.high %v2311_v15, %v4232_v62  ;;  %v2351_v36 = vshrl.u32 %v2311_v15, 16  ;;  %v2349_v32 = vpack.i.b16 %v2311_v15, %v2268_v14 }
 0x98a   : > { %v2312_v57 = vcombine.high %v2296_v11, %v4232_v62  ;;  %v2313_v45 = vcombine.high %v2303_v12, %v4232_v62  ;;  %v2320_v18 = vshrl.u32 %v2296_v11, 16  ;;  %v2336_v21 = vshrl.u32 %v2303_v12, 16 }
 0x98b   : > { %v2317_v25 = vpack.i.b16 %v2296_v11, %v2253_v9  ;;  %v2333_v26 = vpack.i.b16 %v2303_v12, %v2260_v10  ;;  %v2357_v46 = vshrl.u32 %v2314_v24, 16  ;;  %v2352_v34 = vpack.i.b16 %v2351_v36, %v2350_v27 }
 0x98c   : > { %v2328_v20 = vshrl.u32 %v2312_v57, 16  ;;  %v2344_v22 = vshrl.u32 %v2313_v45, 16  ;;  %v2321_v28 = vpack.i.b16 %v2320_v18, %v2319_v16  ;;  %v2325_v31 = vpack.i.b16 %v2312_v57, %v2269_v44 }
 0x98d   : > { %v2337_v37 = vpack.i.b16 %v2336_v21, %v2335_v17  ;;  %v2341_v38 = vpack.i.b16 %v2313_v45, %v2270_v56  ;;  %v2359_v33 = vcombine.low %v2317_v25, %v2333_v26  ;;  %v2355_v47 = vpack.i.b16 %v2314_v24, %v2271_v23  ;;  %v3669_v17 = vld [vmem:[#allocation7 + $0x1] ss:$0 sm:$0xff] }
 0x98e   : > { %v2329_v30 = vpack.i.b16 %v2328_v20, %v2327_v0  ;;  %v2345_v41 = vpack.i.b16 %v2344_v22, %v2343_v19  ;;  %v2358_v52 = vpack.i.b16 %v2357_v46, %v2356_v43 }
 0x98f   : > { %v2367_v48 = vcombine.low %v2325_v31, %v2341_v38  ;;  %v2395_v49 = vcombine.low %v2321_v28, %v2337_v37  ;;  %v2366_v53 = vrot.slane %v2359_v33, %v4561_v42  ;;  %v2385_v35 = vcombine.low %v2349_v32, %v2355_v47 }
 0x990   : > { %v2403_v50 = vcombine.low %v2329_v30, %v2345_v41  ;;  %v2421_v2 = vcombine.low %v2352_v34, %v2358_v52 }
 0x991   : > { %v2374_v54 = vrot.slane %v2367_v48, %v4561_v42  ;;  %v2402_v58 = vrot.slane %v2395_v49, %v4561_v42  ;;  %v2392_v5 = vrot.slane %v2385_v35, %v4572_v51 }
 0x992   : > { %v2410_v60 = vrot.slane %v2403_v50, %v4561_v42  ;;  %v2428_v6 = vrot.slane %v2421_v2, %v4572_v51 }
 0x993   : > { %v2377_v1 = vcombine.low %v2366_v53, %v2374_v54 }
 0x994   : > { %v2413_v3 = vcombine.low %v2402_v58, %v2410_v60 }
 0x995   : > { %v2384_v4 = vrot.slane %v2377_v1, %v4572_v51 }
 0x996   : > { %v2420_v7 = vrot.slane %v2413_v3, %v4572_v51 }
 0x997   : > { %v2393_v9 = vcombine.low %v2384_v4, %v2392_v5  ;;  %v4835_v10 = vcombine.high %v2384_v4, %v2392_v5 }
 0x998   : > { %v2429_v11 = vcombine.low %v2420_v7, %v2428_v6  ;;  %v4837_v12 = vcombine.high %v2420_v7, %v2428_v6 }
 0x999   : > { %v2434_v13 = vshrl.u32 %v2393_v9, 16  ;;  %v2440_v57 = vshrl.u32 %v4835_v10, 16 }
 0x99a   : > { %v2433_v55 = vpack.i.b16 %v2429_v11, %v2393_v9  ;;  %v2435_v44 = vshrl.u32 %v2429_v11, 16  ;;  %v2439_v56 = vpack.i.b16 %v4837_v12, %v4835_v10  ;;  %v2441_v45 = vshrl.u32 %v4837_v12, 16 }
 0x99c   : > { %v2673_v14 = vsel %vm1243_vm4, %v2433_v55, 0  ;;  %v2436_v15 = vpack.i.b16 %v2435_v44, %v2434_v13  ;;  %v4844_v16 = vpack.i.b16 %v2441_v45, %v2440_v57 }
 0x99d   : > { %3848 = vmatpush3.bf16.xpose.msra.mxu0 %v2673_v14 }
 0x99e   : > { %v2719_v0 = vsel %vm1243_vm4, %v2436_v15, 0  ;;  %3859 = vmatprep.subr.bf16.mxu0 %v4224_v8 }
 0x99f   : > { %3854 = vmatpush3.bf16.xpose.msra.mxu1 %v2719_v0 }
 0x9a0   : > { %3865 = vmatprep.subr.bf16.mxu1 %v4224_v8 }
 0xa4c   : > { %v1975_v18 = vpop.f32.mrb[16].mxu0 }
 0xa4d   : > { %v1976_v19 = vadd.f32 %v3669_v17, %v1975_v18  ;;  %v3837_v20 = vpop.f32.mrb[17].mxu0 }
 0xa4e   : > { %v1978_v21 = vpop.f32.mrb[18].mxu0 }
 0xa4f   : > { %v2049_v22 = vpack.c.bf16 %v1976_v19, %v1976_v19  ;;  %v3838_v23 = vpop.f32.mrb[19].mxu0 }
 0xa51   : > { %2053 = vrot.lane.b32.xlu1 %v2049_v22, %s4228_s15  ;;  %2051 = vrot.lane.b32.xlu0 %v2049_v22, %s4227_s16  ;;  %v2063_v26 = vrot.slane %v2049_v22, %v4561_v42  ;;  %s612_s15 = scalar_lea.vmem %s5089_s2, %s4504_s29  ;;  %s5141_s29 = smov 96  }
 0xa52   : > { %s5145_s16 = sld [smem:[#allocation17_spill]] }
 0xa55   : > { %2055 = vrot.lane.b32.xlu0 %v2049_v22, %s4226_s14  ;;  %s5148_s14 = sld [smem:[#allocation20_spill]] }
 0xac3   : > { %v2054_v24 = vpop.permute.xlu1 %2053  ;;  %v2052_v25 = vpop.permute.xlu0 %2051 }
 0xac4   : > { %v2071_v27 = vrot.slane %v2054_v24, %v4561_v42  ;;  %v2097_v38 = vrot.slane %v2052_v25, %v4561_v42  ;;  %v2765_v24 = vsel %vm1243_vm4, %v2439_v56, 0 }
 0xac6   : > { %v2072_v28 = vcombine.low %v2063_v26, %v2071_v27  ;;  %v2073_v31 = vcombine.high %v2063_v26, %v2071_v27  ;;  %v2811_v27 = vsel %vm1243_vm4, %v4844_v16, 0  ;;  %v621_v16 = vld [vmem:[%s612_s15] sm:$0x1]  ;;  %s5042_s15 = scalar_lea.hbm %s5148_s14, %s3708_s13 }
 0xac7   : > { %v2056_v36 = vpop.permute.xlu0 %2055 }
 0xac8   : > { %v2080_v30 = vrot.slane %v2072_v28, %v4572_v51  ;;  %v2105_v37 = vrot.slane %v2056_v36, %v4561_v42  ;;  %v2087_v41 = vrot.slane %v2073_v31, %v4572_v51  ;;  %v622_v36 = vunpack.c.0.s8 %v621_v16 }
 0xaca   : > { %v2106_v43 = vcombine.low %v2097_v38, %v2105_v37  ;;  %v2107_v46 = vcombine.high %v2097_v38, %v2105_v37  ;;  %v2088_v33 = vcombine.high %v2080_v30, %v4232_v62  ;;  %v2089_v47 = vcombine.high %v2087_v41, %v4232_v62 }
 0xacb   : > { %v2128_v48 = vshrl.u32 %v2080_v30, 16  ;;  %v2144_v58 = vshrl.u32 %v2087_v41, 16  ;;  %vm623_vm11 = vcmp.eq.s32.totalorder %v622_v36, 0 }
 0xacc   : > { %v2114_v32 = vrot.slane %v2106_v43, %v4572_v51  ;;  %v2121_v34 = vrot.slane %v2107_v46, %v4572_v51  ;;  %v2136_v54 = vshrl.u32 %v2088_v33, 16  ;;  %v2152_v5 = vshrl.u32 %v2089_v47, 16 }
 0xacd   : > { %v624_v37 = vsel %vm623_vm11, -1e+09, %v4224_v8 }
 0xace   : > { %v2122_v49 = vcombine.high %v2114_v32, %v4232_v62  ;;  %v2123_v50 = vcombine.high %v2121_v34, %v4232_v62  ;;  %v2126_v52 = vpack.i.b16 %v2114_v32, %v2080_v30  ;;  %v2129_v53 = vshrl.u32 %v2114_v32, 16 }
 0xacf   : > { %v2142_v60 = vpack.i.b16 %v2121_v34, %v2087_v41  ;;  %v2145_v1 = vshrl.u32 %v2121_v34, 16  ;;  %v2859_v30 = vsub.s32 0, %v4558_v39 }
 0xad0   : > { %v2130_v35 = vpack.i.b16 %v2129_v53, %v2128_v48  ;;  %v2134_v2 = vpack.i.b16 %v2122_v49, %v2088_v33  ;;  %v2137_v3 = vshrl.u32 %v2122_v49, 16  ;;  %v2150_v4 = vpack.i.b16 %v2123_v50, %v2089_v47 }
 0xad1   : > { %v2146_v6 = vpack.i.b16 %v2145_v1, %v2144_v58  ;;  %v2153_v7 = vshrl.u32 %v2123_v50, 16  ;;  %v2156_v9 = vcombine.low %v2126_v52, %v2142_v60  ;;  %v2860_v38 = vrot.slane %v624_v37, %v2859_v30 }
 0xad2   : > { %v2138_v11 = vpack.i.b16 %v2137_v3, %v2136_v54  ;;  %v2164_v13 = vcombine.low %v2134_v2, %v2150_v4 }
 0xad3   : > { %v2154_v55 = vpack.i.b16 %v2153_v7, %v2152_v5  ;;  %v2181_v44 = vcombine.low %v2130_v35, %v2146_v6  ;;  %v2163_v57 = vrot.slane %v2156_v9, %v4561_v42 }
 0xad4   : > { %v2171_v45 = vrot.slane %v2164_v13, %v4561_v42 }
 0xad5   : > { %v2189_v14 = vcombine.low %v2138_v11, %v2154_v55  ;;  %v2188_v0 = vrot.slane %v2181_v44, %v4561_v42 }
 0xad6   : > { %v2172_v15 = vcombine.low %v2163_v57, %v2171_v45 }
 0xad7   : > { %v2196_v17 = vrot.slane %v2189_v14, %v4561_v42 }
 0xad8   : > { %v2179_v19 = vrot.slane %v2172_v15, %v4572_v51 }
 0xad9   : > { %v2197_v18 = vcombine.low %v2188_v0, %v2196_v17 }
 0xada   : > { %v2209_v22 = vshrl.u32 %v2179_v19, 16  ;;  %v2180_v28 = vcombine.high %v2179_v19, %v4232_v62 }
 0xadb   : > { %v2204_v20 = vrot.slane %v2197_v18, %v4572_v51 }
 0xadc   : > { %v2215_v56 = vshrl.u32 %v2180_v28, 16 }
 0xadd   : > { %v2208_v21 = vpack.i.b16 %v2204_v20, %v2179_v19  ;;  %v2210_v23 = vshrl.u32 %v2204_v20, 16  ;;  %v2205_v26 = vcombine.high %v2204_v20, %v4232_v62 }
 0xadf   : > { %3850 = vmatmul.mubr.msk.bf16.vlgmr.msra.gmra.mrb[20].mxu0 %vm1243_vm4, %v2208_v21  ;;  %v2211_v25 = vpack.i.b16 %v2210_v23, %v2209_v22  ;;  %v2216_v10 = vshrl.u32 %v2205_v26, 16  ;;  %v2214_v12 = vpack.i.b16 %v2205_v26, %v2180_v28 }
 0xae0   : > { %3860 = vmatpush3.bf16.xpose.msra.mxu0 %v2765_v24  ;;  %3861 = vmatprep.mubr.msk.bf16.mxu0 %vm4225_vm1, %v4224_v8 }
 0xae1   : > { %3856 = vmatmul.mubr.msk.bf16.vlgmr.msra.gmra.mrb[28].mxu1 %vm1243_vm4, %v2211_v25  ;;  %3871 = vmatprep.subr.bf16.mxu0 %v4224_v8  ;;  %v2217_v31 = vpack.i.b16 %v2216_v10, %v2215_v56 }
 0xae2   : > { %3866 = vmatpush3.bf16.xpose.msra.mxu1 %v2811_v27  ;;  %3867 = vmatprep.mubr.msk.bf16.mxu1 %vm4225_vm1, %v4224_v8 }
 0xae3   : > { %3877 = vmatprep.subr.bf16.mxu1 %v4224_v8 }
 0xae7   : > { %3862 = vmatmul.mubr.msk.bf16.vlgmr.msra.gmra.mrb[24].mxu0 %vm1243_vm4, %v2214_v12 }
 0xae8   : > { %3873 = vmatprep.mubr.msk.bf16.mxu0 %vm4225_vm1, %v4224_v8 }
 0xae9   : > { %3868 = vmatmul.mubr.msk.bf16.vlgmr.msra.gmra.mrb[32].mxu1 %vm1243_vm4, %v2217_v31 }
 0xaea   : > { %3879 = vmatprep.mubr.msk.bf16.mxu1 %vm4225_vm1, %v4224_v8 }
 0xbb2   : > { %v2709_v41 = vpop.f32.mrb[20].mxu0 }
 0xbb3   : > { %v2853_v43 = vmul.f32 0.35355338, %v2709_v41  ;;  %v3851_v46 = vpop.f32.mrb[21].mxu0 }
 0xbb4   : > { %v2712_v33 = vpop.f32.mrb[22].mxu0  ;;  %v2755_v32 = vpop.f32.mrb[28].mxu1 }
 0xbb5   : > { %v2854_v34 = vmul.f32 0.35355338, %v2755_v32  ;;  %v3852_v47 = vpop.f32.mrb[23].mxu0  ;;  %v3857_v48 = vpop.f32.mrb[29].mxu1  ;;  %v2861_v49 = vadd.f32 %v2860_v38, %v2853_v43 }
 0xbb6   : > { %v2758_v50 = vpop.f32.mrb[30].mxu1 }
 0xbb7   : > { %v3858_v52 = vpop.f32.mrb[31].mxu1  ;;  %v2866_v53 = vsel %vm2865_vm12, %v2861_v49, -inf  ;;  %v2862_v54 = vadd.f32 %v2860_v38, %v2854_v34 }
 0xbb8   : > { %2867 = vmax.xlane.f32.xlu1 %v2866_v53 }
 0xbb9   : > { %v2869_v39 = vsel %vm2865_vm12, %v2862_v54, -inf }
 0xbba   : > { %v2801_v58 = vpop.f32.mrb[24].mxu0  ;;  %2870 = vmax.xlane.f32.xlu0 %v2869_v39 }
 0xbbb   : > { %v2855_v60 = vmul.f32 0.35355338, %v2801_v58  ;;  %v3863_v1 = vpop.f32.mrb[25].mxu0 }
 0xbbc   : > { %v2804_v35 = vpop.f32.mrb[26].mxu0  ;;  %v2847_v2 = vpop.f32.mrb[32].mxu1 }
 0xbbd   : > { %v2856_v3 = vmul.f32 0.35355338, %v2847_v2  ;;  %v3864_v4 = vpop.f32.mrb[27].mxu0  ;;  %v3869_v5 = vpop.f32.mrb[33].mxu1  ;;  %v2863_v6 = vadd.f32 %v2860_v38, %v2855_v60 }
 0xbbe   : > { %v2850_v7 = vpop.f32.mrb[34].mxu1 }
 0xbbf   : > { %v3870_v9 = vpop.f32.mrb[35].mxu1  ;;  %v2872_v11 = vsel %vm2865_vm12, %v2863_v6, -inf  ;;  %v2864_v13 = vadd.f32 %v2860_v38, %v2856_v3 }
 0xbc0   : > { %2873 = vmax.xlane.f32.xlu0 %v2872_v11 }
 0xbc1   : > { %v2875_v55 = vsel %vm2865_vm12, %v2864_v13, -inf }
 0xbc2   : > { %2876 = vmax.xlane.f32.xlu1 %v2875_v55 }
 0xbd3   : > { %2445 = vrot.lane.b32.xlu1 %v4801_v63, %s5141_s29 }
 0xbd6   : > { %2443 = vrot.lane.b32.xlu0 %v4786_v40, %s5141_s29 }
 0xbd7   : > { %2447 = vrot.lane.b32.xlu1 %v4797_v61, %s5141_s29 }
 0xbda   : > { %2449 = vrot.lane.b32.xlu0 %v4799_v29, %s5141_s29 }
 0xc45   : > { %v2868_v44 = vpop.xlane.xlu1 %2867 }
 0xc46   : > { %v2878_v57 = vsub.f32 %v2861_v49, %v2868_v44 }
 0xc47   : > { %v2871_v45 = vpop.xlane.xlu0 %2870 }
 0xc48   : > { %v2882_v14 = vmul.f32 1.442695, %v2878_v57  ;;  %v2879_v15 = vsub.f32 %v2862_v54, %v2871_v45 }
 0xc4a   : > { %4043 = vpow2.f32 %v2882_v14  ;;  %v2884_v0 = vmul.f32 1.442695, %v2879_v15 }
 0xc4c   : > { %4045 = vpow2.f32 %v2884_v0 }
 0xc4d   : > { %v2874_v17 = vpop.xlane.xlu0 %2873 }
 0xc4e   : > { %v2880_v18 = vsub.f32 %v2863_v6, %v2874_v17 }
 0xc4f   : > { %v2877_v63 = vpop.xlane.xlu1 %2876 }
 0xc50   : > { %v2881_v19 = vsub.f32 %v2864_v13, %v2877_v63  ;;  %v2886_v40 = vmul.f32 1.442695, %v2880_v18 }
 0xc51   : > { %v2444_v20 = vpop.permute.xlu0 %2443 }
 0xc52   : > { %v2888_v21 = vmul.f32 1.442695, %v2881_v19  ;;  %4047 = vpow2.f32 %v2886_v40  ;;  %v2461_v36 = vrot.slane %v2444_v20, %v4561_v42 }
 0xc53   : > { %v2446_v22 = vpop.permute.xlu1 %2445 }
 0xc54   : > { %v4910_v61 = vpop.eup %4043  ;;  %v2504_v25 = vrot.slane %v2446_v22, %v4561_v42  ;;  %4049 = vpow2.f32 %v2888_v21 }
 0xc55   : > { %v2450_v23 = vpop.permute.xlu0 %2449  ;;  %v2890_v29 = vsel %vm2865_vm12, %v4910_v61, 0.0 }
 0xc56   : > { %v4914_v24 = vpop.eup %4045  ;;  %v2512_v26 = vrot.slane %v2450_v23, %v4561_v42  ;;  %v3680_v27 = vcombine.high %v2446_v22, %v2450_v23  ;;  %2891 = vadd.xlane.f32.xlu1 %v2890_v29 }
 0xc57   : > { %v2448_v28 = vpop.permute.xlu1 %2447  ;;  %v2893_v10 = vsel %vm2865_vm12, %v4914_v24, 0.0 }
 0xc58   : > { %v2514_v12 = vcombine.low %v2504_v25, %v2512_v26  ;;  %v2515_v56 = vcombine.high %v2504_v25, %v2512_v26  ;;  %v2537_v31 = vrot.slane %v3680_v27, %v4572_v51  ;;  %v2469_v16 = vrot.slane %v2448_v28, %v4561_v42  ;;  %2894 = vadd.xlane.f32.xlu0 %v2893_v10 }
 0xc59   : > { %v3679_v30 = vcombine.high %v2444_v20, %v2448_v28 }
 0xc5a   : > { %v2522_v37 = vrot.slane %v2514_v12, %v4572_v51  ;;  %v2529_v38 = vrot.slane %v2515_v56, %v4572_v51  ;;  %v2540_v41 = vcombine.high %v2537_v31, %v4232_v62  ;;  %v2471_v43 = vcombine.low %v2461_v36, %v2469_v16 }
 0xc5b   : > { %v2472_v46 = vcombine.high %v2461_v36, %v2469_v16  ;;  %v2494_v33 = vrot.slane %v3679_v30, %v4572_v51  ;;  %v2577_v47 = vshrl.u32 %v2537_v31, 16 }
 0xc5c   : > { %v2538_v32 = vcombine.high %v2522_v37, %v4232_v62  ;;  %v2539_v34 = vcombine.high %v2529_v38, %v4232_v62  ;;  %v2546_v48 = vshrl.u32 %v2522_v37, 16  ;;  %v2479_v49 = vrot.slane %v2471_v43, %v4572_v51  ;;  %v4934_v3 = vpop.eup %4047 }
 0xc5d   : > { %v2486_v50 = vrot.slane %v2472_v46, %v4572_v51  ;;  %v2497_v52 = vcombine.high %v2494_v33, %v4232_v62  ;;  %v2562_v54 = vshrl.u32 %v2529_v38, 16  ;;  %v2583_v58 = vshrl.u32 %v2540_v41, 16 }
 0xc5e   : > { %v2554_v53 = vshrl.u32 %v2538_v32, 16  ;;  %v2570_v39 = vshrl.u32 %v2539_v34, 16  ;;  %v2495_v60 = vcombine.high %v2479_v49, %v4232_v62  ;;  %v2543_v35 = vpack.i.b16 %v2522_v37, %v2479_v49  ;;  %v4936_v9 = vpop.eup %4049 }
 0xc5f   : > { %v2496_v1 = vcombine.high %v2486_v50, %v4232_v62  ;;  %v2545_v2 = vshrl.u32 %v2479_v49, 16  ;;  %v2559_v4 = vpack.i.b16 %v2529_v38, %v2486_v50  ;;  %v2561_v5 = vshrl.u32 %v2486_v50, 16 }
 0xc60   : > { %v2576_v6 = vshrl.u32 %v2494_v33, 16  ;;  %v2581_v7 = vpack.i.b16 %v2540_v41, %v2497_v52  ;;  %v2551_v13 = vpack.i.b16 %v2538_v32, %v2495_v60  ;;  %v2553_v55 = vshrl.u32 %v2495_v60, 16 }
 0xc61   : > { %v2547_v11 = vpack.i.b16 %v2546_v48, %v2545_v2  ;;  %v2567_v44 = vpack.i.b16 %v2539_v34, %v2496_v1  ;;  %v2563_v57 = vpack.i.b16 %v2562_v54, %v2561_v5  ;;  %v2569_v45 = vshrl.u32 %v2496_v1, 16 }
 0xc62   : > { %v2582_v14 = vshrl.u32 %v2497_v52, 16  ;;  %v2585_v15 = vcombine.low %v2543_v35, %v2559_v4  ;;  %v2555_v0 = vpack.i.b16 %v2554_v53, %v2553_v55  ;;  %v2575_v62 = vpack.i.b16 %v2537_v31, %v2494_v33 }
 0xc63   : > { %v2593_v17 = vcombine.low %v2551_v13, %v2567_v44  ;;  %v2896_v18 = vsel %vm2865_vm12, %v4934_v3, 0.0  ;;  %v2571_v63 = vpack.i.b16 %v2570_v39, %v2569_v45  ;;  %v2621_v20 = vcombine.low %v2547_v11, %v2563_v57 }
 0xc64   : > { %v2584_v19 = vpack.i.b16 %v2583_v58, %v2582_v14  ;;  %2897 = vadd.xlane.f32.xlu0 %v2896_v18  ;;  %v2899_v40 = vsel %vm2865_vm12, %v4936_v9, 0.0  ;;  %v2611_v21 = vcombine.low %v2575_v62, %v2581_v7  ;;  %v2592_v22 = vrot.slane %v2585_v15, %v4561_v42 }
 0xc65   : > { %2900 = vadd.xlane.f32.xlu1 %v2899_v40  ;;  %v2600_v23 = vrot.slane %v2593_v17, %v4561_v42  ;;  %v2578_v29 = vpack.i.b16 %v2577_v47, %v2576_v6  ;;  %v2629_v25 = vcombine.low %v2555_v0, %v2571_v63  ;;  %v2628_v27 = vrot.slane %v2621_v20, %v4561_v42 }
 0xc66   : > { %v2618_v56 = vrot.slane %v2611_v21, %v4572_v51 }
 0xc67   : > { %v2603_v26 = vcombine.low %v2592_v22, %v2600_v23  ;;  %v2636_v28 = vrot.slane %v2629_v25, %v4561_v42  ;;  %v2647_v10 = vcombine.low %v2578_v29, %v2584_v19 }
 0xc69   : > { %v2610_v12 = vrot.slane %v2603_v26, %v4572_v51  ;;  %v2639_v31 = vcombine.low %v2628_v27, %v2636_v28  ;;  %v2654_v37 = vrot.slane %v2647_v10, %v4572_v51 }
 0xc6b   : > { %v2619_v16 = vcombine.low %v2610_v12, %v2618_v56  ;;  %v2620_v36 = vcombine.high %v2610_v12, %v2618_v56  ;;  %v2646_v30 = vrot.slane %v2639_v31, %v4572_v51 }
 0xc6d   : > { %v2655_v38 = vcombine.low %v2646_v30, %v2654_v37  ;;  %v2656_v41 = vcombine.high %v2646_v30, %v2654_v37  ;;  %v2660_v43 = vshrl.u32 %v2619_v16, 16  ;;  %v2666_v46 = vshrl.u32 %v2620_v36, 16  ;;  %v4011_v30 = vld [vmem:[%s5099_s12] sm:$0xff]  }
 0xc6f   : > { %v2659_v33 = vpack.i.b16 %v2655_v38, %v2619_v16  ;;  %v2661_v32 = vshrl.u32 %v2655_v38, 16  ;;  %v2665_v34 = vpack.i.b16 %v2656_v41, %v2620_v36  ;;  %v2667_v47 = vshrl.u32 %v2656_v41, 16 }
 0xc71   : > { %v2919_v48 = vsel %vm2917_vm13, %v2659_v33, 0  ;;  %v2662_v49 = vpack.i.b16 %v2661_v32, %v2660_v43  ;;  %v3011_v50 = vsel %vm2917_vm13, %v2665_v34, 0  ;;  %v2668_v52 = vpack.i.b16 %v2667_v47, %v2666_v46  ;;  %v4012_v47 = vld [vmem:[%s5099_s12 + $0x8] sm:$0xff]  }
 0xc72   : > { %3872 = vmatpush3.bf16.msra.mxu0 %v2919_v48 }
 0xc73   : > { %v2965_v53 = vsel %vm2917_vm13, %v2662_v49, 0  ;;  %3883 = vmatprep.subr.bf16.mxu0 %v4224_v8  ;;  %v3057_v54 = vsel %vm2917_vm13, %v2668_v52, 0 }
 0xc74   : > { %3878 = vmatpush3.bf16.msra.mxu1 %v2965_v53 }
 0xc75   : > { %3889 = vmatprep.subr.bf16.mxu1 %v4224_v8 }
 0xce3   : > { %v2892_v39 = vpop.xlane.xlu1 %2891 }
 0xce4   : > { %4051 = vrcp.f32 %v2892_v39 }
 0xce5   : > { %v2895_v58 = vpop.xlane.xlu0 %2894 }
 0xce6   : > { %4053 = vrcp.f32 %v2895_v58 }
 0xcee   : > { %v4052_v60 = vpop.eup %4051 }
 0xcef   : > { %v2906_v1 = vmul.f32 %v4052_v60, %v4910_v61 }
 0xcf0   : > { %v4054_v35 = vpop.eup %4053 }
 0xcf1   : > { %v2907_v2 = vmul.f32 %v4054_v35, %v4914_v24  ;;  %v2898_v4 = vpop.xlane.xlu0 %2897  ;;  %v2910_v5 = vpack.c.bf16 %v2906_v1, %v2906_v1 }
 0xcf2   : > { %4055 = vrcp.f32 %v2898_v4  ;;  %v2901_v6 = vpop.xlane.xlu1 %2900 }
 0xcf3   : > { %4057 = vrcp.f32 %v2901_v6  ;;  %3874 = vmatmul.mubr.msk.bf16.vlgmr.msra.gmra.mrb[28].mxu0 %vm2865_vm12, %v2910_v5  ;;  %v2911_v7 = vpack.c.bf16 %v2907_v2, %v2907_v2 }
 0xcf4   : > { %3884 = vmatpush3.bf16.msra.mxu0 %v3011_v50  ;;  %3885 = vmatprep.mubr.msk.bf16.mxu0 %vm4225_vm1, %v4224_v8 }
 0xcf5   : > { %3880 = vmatmul.mubr.msk.bf16.vlgmr.msra.gmra.mrb[36].mxu1 %vm2865_vm12, %v2911_v7  ;;  %3895 = vmatprep.subr.bf16.mxu0 %v4224_v8 }
 0xcf6   : > { %3890 = vmatpush3.bf16.msra.mxu1 %v3057_v54  ;;  %3891 = vmatprep.mubr.msk.bf16.mxu1 %vm4225_vm1, %v4224_v8 }
 0xcf7   : > { %3903 = vmatprep.subr.bf16.mxu1 %v4224_v8 }
 0xcfc   : > { %v4056_v61 = vpop.eup %4055 }
 0xcfd   : > { %v4058_v24 = vpop.eup %4057  ;;  %v2908_v11 = vmul.f32 %v4056_v61, %v4934_v3 }
 0xcfe   : > { %v2909_v13 = vmul.f32 %v4058_v24, %v4936_v9 }
 0xcff   : > { %v2912_v55 = vpack.c.bf16 %v2908_v11, %v2908_v11 }
 0xd00   : > { %v2913_v44 = vpack.c.bf16 %v2909_v13, %v2909_v13 }
 0xd01   : > { %3886 = vmatmul.mubr.msk.bf16.vlgmr.msra.gmra.mrb[32].mxu0 %vm2865_vm12, %v2912_v55 }
 0xd02   : > { %3892 = vmatmul.mubr.msk.bf16.vlgmr.msra.gmra.mrb[40].mxu1 %vm2865_vm12, %v2913_v44  ;;  %3899 = vmatprep.mubr.msk.bf16.mxu0 %vm4225_vm1, %v4224_v8  ;;  %v3691_v44 = vld [vmem:[#allocation7 + $0x2] ss:$0 sm:$0xff] }
 0xd03   : > { %3907 = vmatprep.mubr.msk.bf16.mxu1 %vm4225_vm1, %v4224_v8  ;;  %3896 = vmatpush3.bf16.msra.mxu0 %v4011_v30 }
 0xd04   : > { %3897 = vmatprep.subr.bf16.mxu0 %v4224_v8 }
 0xd07   : > { %3898 = vmatpush3.bf16.msra.mxu0 %v4012_v47 }
 0xd08   : > { %3911 = vmatprep.subr.bf16.mxu0 %v4224_v8 }
 0xdc6   : > { %v2955_v57 = vpop.f32.mrb[28].mxu0 }
 0xdc7   : > { %v3875_v45 = vpop.f32.mrb[29].mxu0 }
 0xdc8   : > { %v2958_v14 = vpop.f32.mrb[30].mxu0  ;;  %v3001_v15 = vpop.f32.mrb[36].mxu1 }
 0xdc9   : > { %v3876_v0 = vpop.f32.mrb[31].mxu0  ;;  %v3881_v3 = vpop.f32.mrb[37].mxu1 }
 0xdca   : > { %v3004_v62 = vpop.f32.mrb[38].mxu1 }
 0xdcb   : > { %v3882_v9 = vpop.f32.mrb[39].mxu1 }
 0xdd4   : > { %v3047_v17 = vpop.f32.mrb[32].mxu0 }
 0xdd5   : > { %v3099_v18 = vcombine.low %v2955_v57, %v3047_v17  ;;  %v3100_v63 = vcombine.high %v2955_v57, %v3047_v17  ;;  %v3887_v19 = vpop.f32.mrb[33].mxu0  ;;  %v3093_v20 = vpop.f32.mrb[40].mxu1 }
 0xdd6   : > { %v3050_v40 = vpop.f32.mrb[34].mxu0  ;;  %v3115_v21 = vcombine.low %v3001_v15, %v3093_v20  ;;  %v3116_v22 = vcombine.high %v3001_v15, %v3093_v20  ;;  %v3893_v23 = vpop.f32.mrb[41].mxu1  ;;  %v4013_v20 = vld [vmem:[%s5145_s16] sm:$0xff]  }
 0xdd7   : > { %v3888_v29 = vpop.f32.mrb[35].mxu0  ;;  %v3096_v25 = vpop.f32.mrb[42].mxu1  ;;  %v3107_v26 = vrot.slane %v3099_v18, %v4561_v42  ;;  %v3114_v27 = vrot.slane %v3100_v63, %v4561_v42  ;;  %3904 = vmatpush3.bf16.msra.mxu1 %v4013_v20  ;;  %v4015_v40 = vld [vmem:[%s5146_s17] sm:$0xff]  }
 0xdd8   : > { %v3123_v28 = vrot.slane %v3115_v21, %v4561_v42  ;;  %v3130_v10 = vrot.slane %v3116_v22, %v4561_v42  ;;  %v3894_v12 = vpop.f32.mrb[43].mxu1  ;;  %3905 = vmatprep.subr.bf16.mxu1 %v4224_v8  ;;  %v4016_v21 = vld [vmem:[%s5146_s17 + $0x8] sm:$0xff]  }
 0xdd9   : > { %v3695_v12 = vld [vmem:[#allocation5 + $0x4] ss:$0 sm:$0xff] }
 0xdda   : > { %v3131_v56 = vcombine.low %v3107_v26, %v3123_v28  ;;  %v3132_v31 = vcombine.high %v3107_v26, %v3123_v28  ;;  %v3147_v16 = vcombine.low %v3114_v27, %v3130_v10  ;;  %v3148_v36 = vcombine.high %v3114_v27, %v3130_v10 }
 0xddc   : > { %v3139_v37 = vrot.slane %v3131_v56, %v4572_v51  ;;  %v3146_v38 = vrot.slane %v3132_v31, %v4572_v51  ;;  %v3155_v41 = vrot.slane %v3147_v16, %v4572_v51  ;;  %v3162_v43 = vrot.slane %v3148_v36, %v4572_v51  ;;  %v3696_v16 = vld [vmem:[#allocation5 + $0x5] ss:$0 sm:$0xff] }
 0xdde   : > { %v3167_v46 = vcombine.low %v3139_v37, %v3146_v38  ;;  %v3689_v33 = vcombine.high %v3139_v37, %v3146_v38  ;;  %v3183_v32 = vcombine.low %v3155_v41, %v3162_v43  ;;  %v3690_v34 = vcombine.high %v3155_v41, %v3162_v43  ;;  %v4017_v38 = vld [vmem:[%s5146_s17 + $0x10] sm:$0xff]   ;;  %v4018_v41 = vld [vmem:[%s5146_s17 + $0x18] sm:$0xff]   ;;  %v3697_v43 = vld [vmem:[%s5147_s0] ss:$0 sm:$0xff]  ;;  %s4237_s0 = smov [#allocation8]  }
 0xde0   : > { %v3174_v48 = vrot.slane %v3167_v46, %v4561_v42  ;;  %v3182_v49 = vrot.slane %v3689_v33, %v4561_v42  ;;  %v3190_v50 = vrot.slane %v3183_v32, %v4561_v42  ;;  %v3198_v52 = vrot.slane %v3690_v34, %v4561_v42 }
 0xde2   : > { %v3200_v53 = vcombine.high %v3174_v48, %v3182_v49  ;;  %v3216_v54 = vcombine.high %v3190_v50, %v3198_v52  ;;  %v3199_v39 = vcombine.low %v3174_v48, %v3182_v49  ;;  %v3215_v58 = vcombine.low %v3190_v50, %v3198_v52 }
 0xde4   : > { %v3214_v60 = vrot.slane %v3200_v53, %v4572_v51  ;;  %v3230_v1 = vrot.slane %v3216_v54, %v4572_v51  ;;  %v3207_v35 = vrot.slane %v3199_v39, %v4572_v51  ;;  %v3223_v2 = vrot.slane %v3215_v58, %v4572_v51 }
 0xde6   : > { %v3233_v4 = vcombine.low %v3214_v60, %v3230_v1  ;;  %v3232_v5 = vcombine.high %v3207_v35, %v3223_v2  ;;  %v3234_v6 = vcombine.high %v3214_v60, %v3230_v1  ;;  %v3231_v7 = vcombine.low %v3207_v35, %v3223_v2 }
 0xde8   : > { %3240 = vrot.lane.b32.xlu1 %v3233_v4, %s5142_s18  ;;  %3236 = vrot.lane.b32.xlu0 %v3232_v5, %s5143_s28  ;;  %s600_s18 = scalar_lea.vmem [#allocation8], %s3643_s26  ;;  %s4153_s26 = sshll.u32 %s4237_s0, 4  ;;  %s4154_s26 = int_to_ptr.vmem [resolvable:$false] %s4153_s26 }
 0xde9   : > { %s3510_s28 = sshll.u32 %s600_s18, 4  ;;  %s4155_s1 = scalar_lea.vmem %s4154_s26, 256  ;;  %s5044_s28 = int_to_ptr.vmem [resolvable:$true] %s3510_s28 }
 0xdea   : > { %s4149_s29 = scalar_lea.vmem %s5044_s28, 128  ;;  %p4156_p12 = scmp.lt.s32.totalorder %s5044_s28, %s4154_s26 }
 0xdeb   : > { %p4150_p1 = scmp.ne.s32.totalorder %s5044_s28, %s4149_s29  ;;  %p4157_p3 = scmp.lt.s32.totalorder %s4155_s1, %s4149_s29 }
 0xdec   : > { %3244 = vrot.lane.b32.xlu1 %v3234_v6, %s5144_s27 }
 0xded   : > { %p4151_p4 = pnand %p4150_p1, %p4442_p6  ;;  %p4158_p7 = por %p4157_p3, %p4156_p12 }
 0xdef   : > { %p4152_p8 = pneg %p4151_p4 }
 0xdf1   : > { %p4159_p10 = pnand %p4158_p7, %p4152_p8 }
 0xe5a   : > { %v3241_v42 = vpop.permute.xlu1 %3240  ;;  %v3237_v61 = vpop.permute.xlu0 %3236 }
 0xe5b   : > { %v3247_v24 = vsel %vm1243_vm4, %v3231_v7, %v3237_v61 }
 0xe5c   : > { %v3248_v13 = vsel %vm1818_vm7, %v3247_v24, %v3241_v42 }
 0xe5e   : > { %v3245_v11 = vpop.permute.xlu1 %3244 }
 0xe5f   : > { %v3249_v55 = vsel %vm1820_vm8, %v3248_v13, %v3245_v11 }
 0xe60   : > { %v3250_v51 = vpack.c.bf16 %v3249_v55, %v3249_v55 }
 0xe62   : > { %3900 = vmatmul.mubr.msk.bf16.vlgmr.msra.gmra.mrb[36].mxu0 %vm635_vm0, %v3250_v51 }
 0xe63   : > { %3919 = vmatprep.mubr.msk.bf16.mxu0 %vm4225_vm1, %v4224_v8  ;;  %3912 = vmatpush3.bf16.msra.mxu0 %v4015_v40  ;;  %vm3450_vm1 = vcmask 523264  }
 0xe64   : > { %3913 = vmatprep.subr.bf16.mxu0 %v4224_v8 }
 0xe67   : > { %3914 = vmatpush3.bf16.msra.mxu0 %v4016_v21 }
 0xe68   : > { %3915 = vmatprep.subr.bf16.mxu0 %v4224_v8 }
 0xe6b   : > { %3916 = vmatpush3.bf16.msra.mxu0 %v4017_v38 }
 0xe6c   : > { %3917 = vmatprep.subr.bf16.mxu0 %v4224_v8  ;;  %v3701_v8 = vld [vmem:[#allocation7 + $0x3] ss:$0 sm:$0xff] }
 0xe6f   : > { %3918 = vmatpush3.bf16.msra.mxu0 %v4018_v41 }
 0xf35   : > { %v3308_v57 = vpop.f32.mrb[36].mxu0 }
 0xf36   : > { %v3309_v45 = vadd.f32 %v3691_v44, %v3308_v57  ;;  %v3901_v14 = vpop.f32.mrb[37].mxu0 }
 0xf37   : > { %v3311_v15 = vpop.f32.mrb[38].mxu0 }
 0xf38   : > { %v5004_v0 = vadd.f32 %v3309_v45, %v4754_v59  ;;  %v3902_v3 = vpop.f32.mrb[39].mxu0  ;;  %v4014_v59 = vld [vmem:[%s5145_s16 + $0x8] sm:$0xff]  }
 0xf39   : > { %3906 = vmatpush3.bf16.msra.mxu1 %v4014_v59 }
 0xf3a   : > { %v3315_v62 = vsel %vm635_vm0, %v5004_v0, 0.0 }
 0xf3b   : > { %3316 = vadd.xlane.f32.xlu0 %v3315_v62 }
 0xfc8   : > { %v3317_v9 = vpop.xlane.xlu0 %3316 }
 0xfc9   : > { %v3318_v17 = vmul.f32 0.03125, %v3317_v9 }
 0xfcb   : > { %v3319_v18 = vsub.f32 %v5004_v0, %v3318_v17 }
 0xfcd   : > { %v3320_v63 = vmul.f32 %v3319_v18, %v3319_v18  ;;  %v3336_v56 = vmul.f32 %v3695_v12, %v3319_v18 }
 0xfcf   : > { %v3321_v19 = vsel %vm635_vm0, %v3320_v63, 0.0 }
 0xfd0   : > { %3322 = vadd.xlane.f32.xlu1 %v3321_v19 }
0x105d   : > { %v3323_v22 = vpop.xlane.xlu1 %3322 }
0x105e   : > { %v3324_v23 = vmul.f32 0.032258064, %v3323_v22 }
0x1060   : > { %4059 = vrsqrt.f32 %v3324_v23  ;;  %vm3327_vm14 = vcmp.eq.f32.partialorder %v3324_v23, inf  ;;  %v3330_v26 = vand.u32 2147483648, %v3324_v23  ;;  %vm3329_vm15 = vcmp.eq.f32.partialorder %v3324_v23, 0.0 }
0x106a   : > { %v4060_v29 = vpop.eup %4059 }
0x106b   : > { %v3326_v25 = vmul.f32 %v4060_v29, %v3324_v23 }
0x106d   : > { %v3328_v27 = vsel %vm3327_vm14, %v3324_v23, %v3326_v25 }
0x106e   : > { %v3331_v28 = vsel %vm3329_vm15, %v3330_v26, %v3328_v27 }
0x106f   : > { %v3337_v10 = vadd.f32 1e-06, %v3331_v28 }
0x1071   : > { %4061 = vrcp.f32 %v3337_v10 }
0x107b   : > { %v4062_v31 = vpop.eup %4061 }
0x107c   : > { %v3339_v36 = vmul.f32 %v4062_v31, %v3336_v56 }
0x107e   : > { %v3344_v30 = vadd.f32 %v3696_v16, %v3339_v36 }
0x1080   : > { %v3345_v37 = vpack.c.bf16 %v3344_v30, %v3344_v30 }
0x1082   : > { %3908 = vmatmul.mubr.msk.bf16.vlgmr.msra.gmra.mrb[44].mxu1 %vm635_vm0, %v3345_v37 }
0x1155   : > { %v3406_v46 = vpop.f32.mrb[44].mxu1 }
0x1156   : > { %v3407_v33 = vadd.f32 %v3697_v43, %v3406_v46  ;;  %v3909_v32 = vpop.f32.mrb[45].mxu1 }
0x1157   : > { %v3409_v34 = vpop.f32.mrb[46].mxu1 }
0x1158   : > { %v3412_v47 = vmax.f32 %v3407_v33, 0.0  ;;  %v3910_v48 = vpop.f32.mrb[47].mxu1 }
0x115a   : > { %v3413_v49 = vpack.c.bf16 %v3412_v47, %v3412_v47 }
0x115c   : > { %3920 = vmatmul.mubr.msk.bf16.vlgmr.msra.gmra.mrb[40].mxu0 %vm3450_vm1, %v3413_v49 }
0x122f   : > { %v3488_v50 = vpop.f32.mrb[40].mxu0 }
0x1230   : > { %v3489_v52 = vadd.f32 %v3701_v8, %v3488_v50  ;;  %v3921_v53 = vpop.f32.mrb[41].mxu0 }
0x1231   : > { %v3491_v54 = vpop.f32.mrb[42].mxu0 }
0x1232   : > { %v3494_v39 = vadd.f32 %v3489_v52, %v5004_v0  ;;  %v3922_v58 = vpop.f32.mrb[43].mxu0 }
0x1234   : > { %3495 = vst.msk [vmem:[%s600_s18] sm:$0xff] %vm635_vm0, %v3494_v39 }
0x1235   : > { %4162 = shalt.err (!%p4159_p10)
}
0x1236   : > { %s4163_s4 = scalar_lea.hbm %s5042_s15, 128  ;;  %s4167_s27 = scalar_lea.hbm %s5148_s14, 256 }
0x1237   : > { %p4164_p13 = scmp.ne.s32.totalorder %s5042_s15, %s4163_s4  ;;  %p4168_p11 = scmp.lt.u32.totalorder %s5042_s15, %s5148_s14 }
0x1238   : > { %p4169_p9 = scmp.lt.u32.totalorder %s4167_s27, %s4163_s4  ;;  %p4171_p1 = scmp.lt.u32.totalorder %s4163_s4, %s5042_s15 }
0x1239   : > { %p4165_p5 = pnand %p4164_p13, %p4442_p6 }
0x123a   : > { %p4170_p2 = por %p4169_p9, %p4168_p11 }
0x123b   : > { %p4166_p0 = pneg %p4165_p5 }
0x123c   : > { %p4172_p4 = por %p4171_p1, %p4170_p2 }
0x123e   : > { %p4173_p8 = pnand %p4172_p4, %p4166_p0 }
0x1240   : > { %4176 = shalt.err (!%p4173_p8)
}
0x1241   : > { %3933 = dma.vmem_to_hbm [thread:$0]  (%p4442_p6), %s5044_s28, 128, %s5042_s15, %s3497_s25  }
0x1242 PF: > { %s5149_s1 = sld [smem:[#allocation12_spill]]  ;;  %s5150_s29 = sld [smem:[#allocation13_spill]] }
0x1243   : > { %p5152_p3 = scmp.ge.s32.totalorder %s4219_s24, 2 }
0x1248   : > { %s3522_s26 = sand.u32 1, %s5149_s1   ;;  %p5151_p12 = scmp.ne.s32.totalorder %s5150_s29, 0 }
0x1249   : > { %s3523_s13 = scalar_lea.sflag [#allocation4], %s3522_s26 }
0x124a   : > { %p3947_p7 = pnand %p5152_p3, %p5151_p12 }
0x124c   : > { %4202 = dma.done.wait (!%p3947_p7), %s3523_s13, 128  }
0x124d   : > { %4204 = vsyncadd (!%p3947_p7), %s3523_s13, 4294967168  ;;  %p30_p10 = scmp.ge.s32.totalorder %s4379_s20, 4   ;;  %s5153_s21 = smov %s4211_s22 }
0x124e   : > { %s5154_s22 = smov %s4215_s23  ;;  %s5155_s23 = smov %s4438_s19 }
0x124f   : > { %s5156_s24 = smov %s4379_s20  ;;  %32 = sbr.rel (!%p30_p10) target bundleno = 14 (0xe), region = 146 }
0x1256   :  { %3528 = vsyncpa [#allocation3], 1 }
0x1257   :  { %3530 = vsyncpa [#allocation3 + $0x1], 1 }
0x1258   :  { %3531 = vsyncpa [#allocation6], 1 }
0x1259   :  { %3532 = vsyncpa [#allocation4], 1 }
0x125a   :  { %3534 = vsyncpa [#allocation4 + $0x1], 1 }

</bundles_post_ra>
